<compile_context>
chip_gen: v6e
topology: v6e:2x2x1
jax: 0.10.0
libtpu: 0.0.40
codegen_flags: <defaults>
</compile_context>

<pallas_src>
import functools

import jax
import jax.numpy as jnp
from jax.experimental import pallas as pl
from jax.experimental.pallas import tpu as pltpu


# Tile constants.  Sized for the smallest VMEM generation (v7x: 64 MiB physical,
# 32 MiB scoped default): the largest live block is the (256, 256) f32 score
# tile (~256 KiB) plus double-buffered (tile, 64) feature tiles -- far under the
# limit on v5e / v6e / v7x.
_ROW_TILE = 512     # row tile for the fused feature / head kernels
_SAL_TQ = 256       # query-row tile for the streaming saliency softmax
_SAL_TK = 256       # key/value-column tile (128-aligned: dense MXU + stores)
_VMEM_LIMIT = 32 * 1024 * 1024


def _round_up(n, m):
    return ((n + m - 1) // m) * m


def _pad_axis(a, target, axis):
    pad = target - a.shape[axis]
    if pad == 0:
        return a
    widths = [(0, 0)] * a.ndim
    widths[axis] = (0, pad)
    return jnp.pad(a, widths)


def _smem_spec():
    return pl.BlockSpec(memory_space=pltpu.MemorySpace.SMEM)


def _stable_sigmoid(x):
    # numerically robust logistic: only exponentiates non-positive values
    z = jnp.exp(-jnp.abs(x))
    return jnp.where(x >= 0, 1.0 / (1.0 + z), z / (1.0 + z))


# ----------------------------------------------------------------------------
# Fused pointwise convs + L2 normalize (row-tiled, single HBM pass)
# ----------------------------------------------------------------------------
def _fused_feats_kernel(x_ref, wb_ref, bb_ref, wp_ref, bp_ref, ws_ref, bs_ref,
                        head_ref, norm_ref, score_ref, *, use_gnn_for_head):
    x = x_ref[...]                                                # (TN, Cin)
    # bottle: Conv1d(k=1)  ==  (TN, Cin) @ (Cin, G) + b
    h = jnp.dot(x, wb_ref[...], preferred_element_type=jnp.float32) + bb_ref[...]
    # TODO(synk): the GCN self/cross graph-attention module (config.nets) sits
    # here in the reference; it is an external unspecified submodule and is
    # treated as identity on the per-point features.
    g = jnp.dot(h, wp_ref[...], preferred_element_type=jnp.float32) + bp_ref[...]
    # proj_score (G -> 1) as a fused VPU weighted reduction instead of a
    # single-output-column MXU matmul.
    score_ref[...] = jnp.sum(g * ws_ref[...], axis=1, keepdims=True) + bs_ref[...]
    # F.normalize(p=2, dim=channel) via EUP rsqrt.
    inv_norm = jax.lax.rsqrt(jnp.sum(g * g, axis=1, keepdims=True) + 1e-24)
    norm_ref[...] = (g * inv_norm).astype(norm_ref.dtype)         # bf16 for MXU
    head_ref[...] = g if use_gnn_for_head else h                  # condition flag


def fused_feats(x, wb, bb, wp, bp, ws, bs, *, use_gnn_for_head):
    n, cin = x.shape
    g = wb.shape[1]
    tn = min(_ROW_TILE, _round_up(n, 8))
    n_pad = _round_up(n, tn)
    xp = _pad_axis(x, n_pad, 0)

    const = lambda i: (0, 0)
    row = lambda i: (i, 0)

    feats_head, feats_norm, scores = pl.pallas_call(
        functools.partial(_fused_feats_kernel, use_gnn_for_head=use_gnn_for_head),
        out_shape=(
            jax.ShapeDtypeStruct((n_pad, g), jnp.float32),    # feats for head
            jax.ShapeDtypeStruct((n_pad, g), jnp.bfloat16),   # L2-normalized feats
            jax.ShapeDtypeStruct((n_pad, 1), jnp.float32),    # proj_score output
        ),
        grid=(n_pad // tn,),
        in_specs=[
            pl.BlockSpec((tn, cin), row),
            pl.BlockSpec((cin, g), const),
            pl.BlockSpec((1, g), const),
            pl.BlockSpec((g, g), const),
            pl.BlockSpec((1, g), const),
            pl.BlockSpec((1, g), const),
            pl.BlockSpec((1, 1), const),
        ],
        out_specs=(
            pl.BlockSpec((tn, g), row),
            pl.BlockSpec((tn, g), row),
            pl.BlockSpec((tn, 1), row),
        ),
        compiler_params=pltpu.CompilerParams(
            dimension_semantics=("parallel",),
            vmem_limit_bytes=_VMEM_LIMIT,
        ),
    )(xp, wb, bb, wp, bp, ws, bs)
    return feats_head[:n], feats_norm[:n], scores[:n]


# ----------------------------------------------------------------------------
# Streaming cross-softmax saliency (flash-style, no (Ns, Nt) materialization)
# ----------------------------------------------------------------------------
def _saliency_kernel(invt_ref, nk_ref, q_ref, kt_ref, v_ref, o_ref,
                     m_sc, l_sc, acc_sc, *, tile_k):
    kv = pl.program_id(1)

    @pl.when(kv == 0)
    def _():
        m_sc[...] = jnp.full_like(m_sc, -jnp.inf)
        l_sc[...] = jnp.zeros_like(l_sc)
        acc_sc[...] = jnp.zeros_like(acc_sc)

    inv_t = invt_ref[0, 0]            # 1 / (exp(epsilon) + 0.03), from SMEM
    nk = nk_ref[0, 0]                 # number of valid (unpadded) tgt columns

    # (TQ, C) x (C, TK) on the MXU, bf16 operands, f32 accumulation.
    s = jnp.dot(q_ref[...], kt_ref[...], preferred_element_type=jnp.float32) * inv_t

    # Mask padded tgt columns out of the softmax.
    col = kv * tile_k + jax.lax.broadcasted_iota(jnp.int32, (1, tile_k), 1)
    s = jnp.where(col < nk, s, -1e30)

    m_prev = m_sc[...]
    m_new = jnp.maximum(m_prev, jnp.max(s, axis=1, keepdims=True))
    alpha = jnp.exp(m_prev - m_new)
    p = jnp.exp(s - m_new)                                         # (TQ, TK)
    l_sc[...] = alpha * l_sc[...] + jnp.sum(p, axis=1, keepdims=True)
    # Weighted VPU reduction replaces the (TQ, TK) @ (TK, 1) matmul.
    acc_sc[...] = alpha * acc_sc[...] + jnp.sum(p * v_ref[...], axis=1, keepdims=True)
    m_sc[...] = m_new

    @pl.when(kv == pl.num_programs(1) - 1)
    def _():
        o_ref[...] = acc_sc[...] * pl.reciprocal(l_sc[...], approx=True)


def cross_saliency(inv_t, q_feats, kt_feats, v_scores):
    """softmax(q @ kT / t, axis=1) @ v, streamed over tgt tiles.

    q_feats: (Nq, C) bf16, kt_feats: (C, Nk) bf16, v_scores: (1, Nk) f32.
    Returns (Nq, 1) f32.
    """
    nq, c = q_feats.shape
    nk = kt_feats.shape[1]
    tq = min(_SAL_TQ, _round_up(nq, 8))
    tk = min(_SAL_TK, _round_up(nk, 128))
    nq_pad = _round_up(nq, tq)
    nk_pad = _round_up(nk, tk)

    qp = _pad_axis(q_feats, nq_pad, 0)
    ktp = _pad_axis(kt_feats, nk_pad, 1)
    vp = _pad_axis(v_scores, nk_pad, 1)
    nk_arr = jnp.full((1, 1), nk, jnp.int32)

    out = pl.pallas_call(
        functools.partial(_saliency_kernel, tile_k=tk),
        out_shape=jax.ShapeDtypeStruct((nq_pad, 1), jnp.float32),
        grid=(nq_pad // tq, nk_pad // tk),
        in_specs=[
            _smem_spec(),                                   # 1/temperature
            _smem_spec(),                                   # valid tgt count
            pl.BlockSpec((tq, c), lambda i, j: (i, 0)),     # src (query) tile
            pl.BlockSpec((c, tk), lambda i, j: (0, j)),     # tgt feats^T tile
            pl.BlockSpec((1, tk), lambda i, j: (0, j)),     # tgt scores (lane-dense)
        ],
        out_specs=pl.BlockSpec((tq, 1), lambda i, j: (i, 0)),
        scratch_shapes=[
            pltpu.VMEM((tq, 1), jnp.float32),               # running max
            pltpu.VMEM((tq, 1), jnp.float32),               # running denominator
            pltpu.VMEM((tq, 1), jnp.float32),               # running numerator
        ],
        compiler_params=pltpu.CompilerParams(
            dimension_semantics=("parallel", "arbitrary"),
            vmem_limit_bytes=_VMEM_LIMIT,
        ),
    )(inv_t, nk_arr, qp, ktp, vp)
    return out[:nq]


# ----------------------------------------------------------------------------
# Head: final L2 normalize + sigmoid/clamp/regular_score (row-tiled)
# ----------------------------------------------------------------------------
def _head_kernel(f_ref, so_ref, ss_ref, ff_ref, oo_ref, os_ref):
    f = f_ref[...]
    inv_norm = jax.lax.rsqrt(jnp.sum(f * f, axis=1, keepdims=True) + 1e-24)
    ff_ref[...] = f * inv_norm

    def _score(col):
        s = _stable_sigmoid(col)                               # sigmoid
        s = jnp.clip(s, 0.0, 1.0)                              # clamp(0, 1)
        s = jnp.where(jnp.isnan(s), jnp.zeros_like(s), s)      # regular_score
        s = jnp.where(jnp.isinf(s), jnp.zeros_like(s), s)
        return s

    oo_ref[...] = _score(so_ref[...])
    os_ref[...] = _score(ss_ref[...])


def head(feats, scores_overlap_raw, scores_saliency_raw):
    n, d = feats.shape
    tn = min(_ROW_TILE, _round_up(n, 8))
    n_pad = _round_up(n, tn)
    fp = _pad_axis(feats, n_pad, 0)
    sop = _pad_axis(scores_overlap_raw, n_pad, 0)
    ssp = _pad_axis(scores_saliency_raw, n_pad, 0)
    row = lambda i: (i, 0)

    ff, so, ss = pl.pallas_call(
        _head_kernel,
        out_shape=(
            jax.ShapeDtypeStruct((n_pad, d), jnp.float32),
            jax.ShapeDtypeStruct((n_pad, 1), jnp.float32),
            jax.ShapeDtypeStruct((n_pad, 1), jnp.float32),
        ),
        grid=(n_pad // tn,),
        in_specs=[
            pl.BlockSpec((tn, d), row),
            pl.BlockSpec((tn, 1), row),
            pl.BlockSpec((tn, 1), row),
        ],
        out_specs=(
            pl.BlockSpec((tn, d), row),
            pl.BlockSpec((tn, 1), row),
            pl.BlockSpec((tn, 1), row),
        ),
        compiler_params=pltpu.CompilerParams(
            dimension_semantics=("parallel",),
            vmem_limit_bytes=_VMEM_LIMIT,
        ),
    )(fp, sop, ssp)
    return ff[:n], so[:n], ss[:n]


# ----------------------------------------------------------------------------
# Model wrapper (parameter setup + glue in plain JAX)
# ----------------------------------------------------------------------------
class OverlapPredatorPallas:
    def __init__(self, config, key):
        self.config = config
        in_dim = config["in_feats_dim"]          # channel dim fed to `bottle`
        gnn = config["gnn_feats_dim"]
        self.final_feats_dim = config["final_feats_dim"]
        self.condition = config["condition_feature"]
        self.add_cross_overlap = config["add_cross_score"]

        keys = jax.random.split(key, 6)

        def conv1d_params(kw, kb, cin, cout):
            # PyTorch Conv1d default init: U(-1/sqrt(fan_in), 1/sqrt(fan_in))
            bound = 1.0 / (cin ** 0.5)
            w = jax.random.uniform(kw, (cin, cout), jnp.float32, -bound, bound)
            b = jax.random.uniform(kb, (1, cout), jnp.float32, -bound, bound)
            return w, b

        self.bottle_w, self.bottle_b = conv1d_params(keys[0], keys[1], in_dim, gnn)
        self.proj_gnn_w, self.proj_gnn_b = conv1d_params(keys[2], keys[3], gnn, gnn)
        ws, bs = conv1d_params(keys[4], keys[5], gnn, 1)
        self.proj_score_w = ws.T                 # stored (1, G) for VPU reduction
        self.proj_score_b = bs                   # (1, 1)
        self.epsilon = jnp.float32(-5.0)         # learned temperature parameter

    def __call__(self, batch):
        x = batch["features"]                       # (N_total, in_feats_dim)
        len_src_c = batch["stack_lengths"][-1][0]   # python int

        # TODO(synk): KPConv encoder blocks (block_decider / neighborhood convs
        # over batch['points']/'neighbors') are external unspecified modules;
        # the encoder (and its skip connections) is treated as identity here.

        # bottle + (identity GCN) + proj_gnn + proj_score + L2 normalize,
        # fused into one row-tiled pass (activations hit HBM exactly once).
        feats_head, feats_gnn_norm, scores_c_raw = fused_feats(
            x, self.bottle_w, self.bottle_b,
            self.proj_gnn_w, self.proj_gnn_b,
            self.proj_score_w, self.proj_score_b,
            use_gnn_for_head=self.condition,
        )

        src_feats_gnn = feats_gnn_norm[:len_src_c]   # bf16 (Ns, G)
        tgt_feats_gnn = feats_gnn_norm[len_src_c:]   # bf16 (Nt, G)
        src_scores_c = scores_c_raw[:len_src_c]      # f32 (Ns, 1)
        tgt_scores_c = scores_c_raw[len_src_c:]      # f32 (Nt, 1)

        # temperature = exp(epsilon) + 0.03 ; fold to 1/t, passed via SMEM.
        inv_t = (1.0 / (jnp.exp(self.epsilon) + 0.03)).reshape(1, 1).astype(jnp.float32)

        # streaming cross softmax saliency; s2 reuses the same kernel with the
        # src/tgt roles swapped (no (Ns, Nt) matrix and no transpose of it).
        s1 = cross_saliency(inv_t, src_feats_gnn, tgt_feats_gnn.T,
                            tgt_scores_c.reshape(1, -1))
        s2 = cross_saliency(inv_t, tgt_feats_gnn, src_feats_gnn.T,
                            src_scores_c.reshape(1, -1))
        scores_saliency = jnp.concatenate([s1, s2], axis=0)

        # TODO(synk): KPConv decoder blocks + upsample/skip concats are external
        # unspecified modules; the decoder is treated as identity, so the head
        # consumes scores_c / scores_saliency / features as separate inputs
        # instead of slicing a concatenated decoder output (this also fixes the
        # column-offset mismatch of the identity-decoder placeholder and avoids
        # the HBM round trip of the axis=1 concatenation).
        feats_f, scores_overlap, scores_sal = head(
            feats_head[:, : self.final_feats_dim], scores_c_raw, scores_saliency
        )
        return {
            "feats_f": feats_f,
            "scores_overlap": scores_overlap.reshape(-1),
            "scores_saliency": scores_sal.reshape(-1),
        }


# ----------------------------------------------------------------------------
# Example run
# ----------------------------------------------------------------------------
if __name__ == "__main__":
    config = dict(
        in_feats_dim=32,
        gnn_feats_dim=64,
        final_feats_dim=64,        # == gnn_feats_dim (decoder is identity here)
        condition_feature=True,
        add_cross_score=True,
        num_kernel_points=15,      # unused (KPConv blocks are TODO)
    )

    key = jax.random.PRNGKey(0)
    k_model, k_feat, k_pts = jax.random.split(key, 3)

    # deliberately non-tile-aligned sizes to exercise row padding / col masking
    n_src, n_tgt = 200, 152
    n_total = n_src + n_tgt

    batch = {
        "features": jax.random.normal(
            k_feat, (n_total, config["in_feats_dim"]), jnp.float32),
        "points": [jax.random.normal(k_pts, (n_total, 3), jnp.float32)],  # (GCN TODO)
        "stack_lengths": [(n_src, n_tgt)],
    }

    model = OverlapPredatorPallas(config, k_model)
    out = model(batch)
    jax.block_until_ready(out)

    assert out["feats_f"].shape == (n_total, config["final_feats_dim"])
    assert out["scores_overlap"].shape == (n_total,)
    assert out["scores_saliency"].shape == (n_total,)
    assert bool(jnp.all(jnp.isfinite(out["feats_f"])))
    assert bool(jnp.all((out["scores_overlap"] >= 0.0) & (out["scores_overlap"] <= 1.0)))
    assert bool(jnp.all((out["scores_saliency"] >= 0.0) & (out["scores_saliency"] <= 1.0)))
    print("KERNEL_OK")
</pallas_src>

<mosaic_0001>
module attributes {stable_mosaic.version = 11 : i64} {
  func.func @_fused_feats_kernel(%arg0: i32, %arg1: memref<352x32xf32, #tpu.memory_space<vmem>>, %arg2: memref<32x64xf32, #tpu.memory_space<vmem>>, %arg3: memref<1x64xf32, #tpu.memory_space<vmem>>, %arg4: memref<64x64xf32, #tpu.memory_space<vmem>>, %arg5: memref<1x64xf32, #tpu.memory_space<vmem>>, %arg6: memref<1x64xf32, #tpu.memory_space<vmem>>, %arg7: memref<1x1xf32, #tpu.memory_space<vmem>>, %arg8: memref<352x64xf32, #tpu.memory_space<vmem>>, %arg9: memref<352x64xbf16, #tpu.memory_space<vmem>>, %arg10: memref<352x1xf32, #tpu.memory_space<vmem>>) attributes {dimension_semantics = [#tpu.dimension_semantics<parallel>], iteration_bounds = array<i64: 1>, scalar_prefetch = 0 : i64, scratch_operands = 0 : i64, tpu.core_type = #tpu.core_type<tc>, window_params = [{transform_indices = @transform_0, window_bounds = array<i64: 352, 32>}, {pipeline_mode = #tpu.pipeline_mode<synchronous>, transform_indices = @transform_1, window_bounds = array<i64: 32, 64>}, {pipeline_mode = #tpu.pipeline_mode<synchronous>, transform_indices = @transform_2, window_bounds = array<i64: 1, 64>}, {pipeline_mode = #tpu.pipeline_mode<synchronous>, transform_indices = @transform_3, window_bounds = array<i64: 64, 64>}, {pipeline_mode = #tpu.pipeline_mode<synchronous>, transform_indices = @transform_4, window_bounds = array<i64: 1, 64>}, {pipeline_mode = #tpu.pipeline_mode<synchronous>, transform_indices = @transform_5, window_bounds = array<i64: 1, 64>}, {pipeline_mode = #tpu.pipeline_mode<synchronous>, transform_indices = @transform_6, window_bounds = array<i64: 1, 1>}, {transform_indices = @transform_7, window_bounds = array<i64: 352, 64>}, {transform_indices = @transform_8, window_bounds = array<i64: 352, 64>}, {transform_indices = @transform_9, window_bounds = array<i64: 352, 1>}]} {
    %c0 = arith.constant 0 : index
    %c0_0 = arith.constant 0 : index
    %0 = vector.load %arg1[%c0, %c0_0] : memref<352x32xf32, #tpu.memory_space<vmem>>, vector<352x32xf32>
    %c0_1 = arith.constant 0 : index
    %c0_2 = arith.constant 0 : index
    %1 = vector.load %arg2[%c0_1, %c0_2] : memref<32x64xf32, #tpu.memory_space<vmem>>, vector<32x64xf32>
    %cst = arith.constant dense<0.000000e+00> : vector<352x64xf32>
    %2 = tpu.matmul %0, %1, %cst {dimension_numbers = #tpu.dot_dimension_numbers<[1], [0], [0], [1], [0, 0, 1, 1], [], []>} : vector<352x32xf32>, vector<32x64xf32>, vector<352x64xf32> -> vector<352x64xf32>
    %c0_3 = arith.constant 0 : index
    %c0_4 = arith.constant 0 : index
    %3 = vector.load %arg3[%c0_3, %c0_4] : memref<1x64xf32, #tpu.memory_space<vmem>>, vector<1x64xf32>
    %4 = vector.broadcast %3 : vector<1x64xf32> to vector<352x64xf32>
    %5 = arith.addf %2, %4 : vector<352x64xf32>
    %c0_5 = arith.constant 0 : index
    %c0_6 = arith.constant 0 : index
    %6 = vector.load %arg4[%c0_5, %c0_6] : memref<64x64xf32, #tpu.memory_space<vmem>>, vector<64x64xf32>
    %cst_7 = arith.constant dense<0.000000e+00> : vector<352x64xf32>
    %7 = tpu.matmul %5, %6, %cst_7 {dimension_numbers = #tpu.dot_dimension_numbers<[1], [0], [0], [1], [0, 0, 1, 1], [], []>} : vector<352x64xf32>, vector<64x64xf32>, vector<352x64xf32> -> vector<352x64xf32>
    %c0_8 = arith.constant 0 : index
    %c0_9 = arith.constant 0 : index
    %8 = vector.load %arg5[%c0_8, %c0_9] : memref<1x64xf32, #tpu.memory_space<vmem>>, vector<1x64xf32>
    %9 = vector.broadcast %8 : vector<1x64xf32> to vector<352x64xf32>
    %10 = arith.addf %7, %9 : vector<352x64xf32>
    %c0_10 = arith.constant 0 : index
    %c0_11 = arith.constant 0 : index
    %11 = vector.load %arg6[%c0_10, %c0_11] : memref<1x64xf32, #tpu.memory_space<vmem>>, vector<1x64xf32>
    %12 = vector.broadcast %11 : vector<1x64xf32> to vector<352x64xf32>
    %13 = arith.mulf %10, %12 : vector<352x64xf32>
    %cst_12 = arith.constant dense<0.000000e+00> : vector<352xf32>
    %14 = vector.multi_reduction <add>, %13, %cst_12 [1] : vector<352x64xf32> to vector<352xf32>
    %15 = vector.shape_cast %14 : vector<352xf32> to vector<352x1xf32>
    %c0_13 = arith.constant 0 : index
    %c0_14 = arith.constant 0 : index
    %16 = vector.load %arg7[%c0_13, %c0_14] : memref<1x1xf32, #tpu.memory_space<vmem>>, vector<1x1xf32>
    %17 = vector.broadcast %16 : vector<1x1xf32> to vector<352x1xf32>
    %18 = arith.addf %15, %17 : vector<352x1xf32>
    %c0_15 = arith.constant 0 : index
    %c0_16 = arith.constant 0 : index
    %19 = vector.load %arg10[%c0_15, %c0_16] : memref<352x1xf32, #tpu.memory_space<vmem>>, vector<352x1xf32>
    tpu.vector_store %arg10[%c0_15, %c0_16], %18 {strides = array<i32>} : memref<352x1xf32, #tpu.memory_space<vmem>>, vector<352x1xf32>,
    %20 = arith.mulf %10, %10 : vector<352x64xf32>
    %cst_17 = arith.constant dense<0.000000e+00> : vector<352xf32>
    %21 = vector.multi_reduction <add>, %20, %cst_17 [1] : vector<352x64xf32> to vector<352xf32>
    %22 = vector.shape_cast %21 : vector<352xf32> to vector<352x1xf32>
    %cst_18 = arith.constant 1.000000e-24 : f32
    %23 = vector.broadcast %cst_18 : f32 to vector<352x1xf32>
    %24 = arith.addf %22, %23 : vector<352x1xf32>
    %25 = math.rsqrt %24 : vector<352x1xf32>
    %26 = vector.broadcast %25 : vector<352x1xf32> to vector<352x64xf32>
    %27 = arith.mulf %10, %26 : vector<352x64xf32>
    %28 = arith.truncf %27 : vector<352x64xf32> to vector<352x64xbf16>
    %c0_19 = arith.constant 0 : index
    %c0_20 = arith.constant 0 : index
    %29 = vector.load %arg9[%c0_19, %c0_20] : memref<352x64xbf16, #tpu.memory_space<vmem>>, vector<352x64xbf16>
    tpu.vector_store %arg9[%c0_19, %c0_20], %28 {strides = array<i32>} : memref<352x64xbf16, #tpu.memory_space<vmem>>, vector<352x64xbf16>,
    %c0_21 = arith.constant 0 : index
    %c0_22 = arith.constant 0 : index
    %30 = vector.load %arg8[%c0_21, %c0_22] : memref<352x64xf32, #tpu.memory_space<vmem>>, vector<352x64xf32>
    tpu.vector_store %arg8[%c0_21, %c0_22], %10 {strides = array<i32>} : memref<352x64xf32, #tpu.memory_space<vmem>>, vector<352x64xf32>,
    return
  }
  func.func @transform_0(%arg0: i32) -> (i32, i32) {
    %c0_i32 = arith.constant 0 : i32
    %c0_i32_0 = arith.constant 0 : i32
    return %arg0, %c0_i32 : i32, i32
  }
  func.func @transform_1(%arg0: i32) -> (i32, i32) {
    %c0_i32 = arith.constant 0 : i32
    %c0_i32_0 = arith.constant 0 : i32
    %c0_i32_1 = arith.constant 0 : i32
    return %c0_i32, %c0_i32_0 : i32, i32
  }
  func.func @transform_2(%arg0: i32) -> (i32, i32) {
    %c0_i32 = arith.constant 0 : i32
    %c0_i32_0 = arith.constant 0 : i32
    %c0_i32_1 = arith.constant 0 : i32
    return %c0_i32, %c0_i32_0 : i32, i32
  }
  func.func @transform_3(%arg0: i32) -> (i32, i32) {
    %c0_i32 = arith.constant 0 : i32
    %c0_i32_0 = arith.constant 0 : i32
    %c0_i32_1 = arith.constant 0 : i32
    return %c0_i32, %c0_i32_0 : i32, i32
  }
  func.func @transform_4(%arg0: i32) -> (i32, i32) {
    %c0_i32 = arith.constant 0 : i32
    %c0_i32_0 = arith.constant 0 : i32
    %c0_i32_1 = arith.constant 0 : i32
    return %c0_i32, %c0_i32_0 : i32, i32
  }
  func.func @transform_5(%arg0: i32) -> (i32, i32) {
    %c0_i32 = arith.constant 0 : i32
    %c0_i32_0 = arith.constant 0 : i32
    %c0_i32_1 = arith.constant 0 : i32
    return %c0_i32, %c0_i32_0 : i32, i32
  }
  func.func @transform_6(%arg0: i32) -> (i32, i32) {
    %c0_i32 = arith.constant 0 : i32
    %c0_i32_0 = arith.constant 0 : i32
    %c0_i32_1 = arith.constant 0 : i32
    return %c0_i32, %c0_i32_0 : i32, i32
  }
  func.func @transform_7(%arg0: i32) -> (i32, i32) {
    %c0_i32 = arith.constant 0 : i32
    %c0_i32_0 = arith.constant 0 : i32
    return %arg0, %c0_i32 : i32, i32
  }
  func.func @transform_8(%arg0: i32) -> (i32, i32) {
    %c0_i32 = arith.constant 0 : i32
    %c0_i32_0 = arith.constant 0 : i32
    return %arg0, %c0_i32 : i32, i32
  }
  func.func @transform_9(%arg0: i32) -> (i32, i32) {
    %c0_i32 = arith.constant 0 : i32
    %c0_i32_0 = arith.constant 0 : i32
    return %arg0, %c0_i32 : i32, i32
  }
}

</mosaic_0001>

<bundles_post_ra>
// kernel: tpu_custom_call.1
= control target key start
LH: loop header
LB: loop body
LE: loop exit
PB: predicated region body
PF: predicated region fallthrough
CT: control target
= control target key end

     0   :  { %vm86_vm0 = vcmask 261120   ;;  %vm519_vm1 = vcmask 523264   ;;  %vm1171_vm2 = vcmask 7168   ;;  %vm1700_vm3 = vcmask 519168   ;;  %s3767_s1 = inlined_call_operand.vmem [shape: f32[32,64], index: 1, kind: input, shape index: {}]   ;;  %s3768_s0 = inlined_call_operand.vmem [shape: f32[352,32], index: 0, kind: input, shape index: {}]   ;;  %s3769_s3 = inlined_call_operand.vmem [shape: f32[64,64], index: 3, kind: input, shape index: {}]   ;;  %s3770_s2 = inlined_call_operand.vmem [shape: f32[1,64], index: 2, kind: input, shape index: {}]   ;;  %s3771_s4 = inlined_call_operand.vmem [shape: f32[1,64], index: 4, kind: input, shape index: {}]   ;;  %s3772_s5 = inlined_call_operand.vmem [shape: f32[1,64], index: 5, kind: input, shape index: {}]   ;;  %s3773_s7 = inlined_call_operand.vmem [shape: f32[352,64], index: 7, kind: output, shape index: {0}]   ;;  %s3774_s6 = inlined_call_operand.<no memory space> [shape: f32[1,1], index: 6, kind: input, shape index: {}]   ;;  %s3775_s9 = inlined_call_operand.vmem [shape: f32[352,1], index: 9, kind: output, shape index: {2}]   ;;  %s3776_s8 = inlined_call_operand.vmem [shape: bf16[352,64], index: 8, kind: output, shape index: {1}]  }
   0x1   :  { %v78_v0 = vld [vmem:[%s3767_s1 + $0x18] sm:$0xff]  ;;  %v77_v1 = vld [vmem:[%s3767_s1 + $0x10] sm:$0xff]  ;;  %v31_v2 = vld [vmem:[%s3768_s0] sm:$0xff] }
   0x2   :  { %2081 = vmatprep.subr.mxu0 %v78_v0  ;;  %v76_v3 = vld [vmem:[%s3767_s1 + $0x8] sm:$0xff]  ;;  %2089 = vmatprep.mubr.msk.f32.mxu0 %vm86_vm0, %v31_v2  ;;  %v75_v4 = vld [vmem:[%s3767_s1] sm:$0xff]  ;;  %v33_v6 = vld [vmem:[%s3768_s0 + $0x10] sm:$0xff] }
   0x3   :  { %2082 = vmatpush3.msra.mxu0 %v78_v0  ;;  %v32_v5 = vld [vmem:[%s3768_s0 + $0x8] sm:$0xff]  ;;  %v34_v7 = vld [vmem:[%s3768_s0 + $0x18] sm:$0xff]  ;;  %v35_v8 = vld [vmem:[%s3768_s0 + $0x20] sm:$0xff] }
   0x4   :  { %2083 = vmatprep.subr.mxu0 %v77_v1  ;;  %v511_v9 = vld [vmem:[%s3769_s3 + $0x38] sm:$0xff]  ;;  %v510_v10 = vld [vmem:[%s3769_s3 + $0x30] sm:$0xff]  ;;  %v36_v11 = vld [vmem:[%s3768_s0 + $0x28] sm:$0xff] }
   0x5   :  { %2084 = vmatpush3.msra.mxu0 %v77_v1  ;;  %2237 = vmatprep.subr.mxu1 %v511_v9  ;;  %v509_v12 = vld [vmem:[%s3769_s3 + $0x28] sm:$0xff]  ;;  %v37_v13 = vld [vmem:[%s3768_s0 + $0x30] sm:$0xff]  ;;  %v508_v14 = vld [vmem:[%s3769_s3 + $0x20] sm:$0xff] }
   0x6   :  { %2085 = vmatprep.subr.mxu0 %v76_v3  ;;  %2245 = vmatpush3.msra.mxu1 %v511_v9  ;;  %v38_v15 = vld [vmem:[%s3768_s0 + $0x38] sm:$0xff]  ;;  %v39_v17 = vld [vmem:[%s3768_s0 + $0x40] sm:$0xff]  ;;  %v506_v18 = vld [vmem:[%s3769_s3 + $0x10] sm:$0xff] }
   0x7   :  { %2086 = vmatpush3.msra.mxu0 %v76_v3  ;;  %2238 = vmatprep.subr.mxu1 %v510_v10  ;;  %v507_v16 = vld [vmem:[%s3769_s3 + $0x18] sm:$0xff]  ;;  %v40_v19 = vld [vmem:[%s3768_s0 + $0x48] sm:$0xff]  ;;  %v41_v21 = vld [vmem:[%s3768_s0 + $0x50] sm:$0xff] }
   0x8   :  { %2087 = vmatprep.subr.mxu0 %v75_v4  ;;  %2246 = vmatpush3.msra.mxu1 %v510_v10  ;;  %v505_v20 = vld [vmem:[%s3769_s3 + $0x8] sm:$0xff]  ;;  %v504_v22 = vld [vmem:[%s3769_s3] sm:$0xff]  ;;  %v42_v23 = vld [vmem:[%s3768_s0 + $0x58] sm:$0xff] }
   0x9   :  { %2088 = vmatpush3.msra.mxu0 %v75_v4  ;;  %2239 = vmatprep.subr.mxu1 %v509_v12  ;;  %v43_v24 = vld [vmem:[%s3768_s0 + $0x60] sm:$0xff]  ;;  %v44_v25 = vld [vmem:[%s3768_s0 + $0x68] sm:$0xff]  ;;  %v45_v26 = vld [vmem:[%s3768_s0 + $0x70] sm:$0xff] }
   0xa   :  { %2090 = vmatmul.mubr.msk.f32.vlgmr.msra.gmra.mxu0 %vm86_vm0, %v32_v5  ;;  %2155 = vmatprep.subr.mxu0 %v511_v9  ;;  %v46_v27 = vld [vmem:[%s3768_s0 + $0x78] sm:$0xff]  ;;  %v47_v28 = vld [vmem:[%s3768_s0 + $0x80] sm:$0xff]  ;;  %v48_v29 = vld [vmem:[%s3768_s0 + $0x88] sm:$0xff] }
   0xb   :  { %2092 = vmatprep.mubr.msk.f32.mxu0 %vm86_vm0, %v33_v6  ;;  %2156 = vmatpush3.msra.mxu0 %v511_v9  ;;  %v49_v30 = vld [vmem:[%s3768_s0 + $0x90] sm:$0xff]  ;;  %v50_v31 = vld [vmem:[%s3768_s0 + $0x98] sm:$0xff]  ;;  %v51_v32 = vld [vmem:[%s3768_s0 + $0xa0] sm:$0xff] }
   0xc   :  { %2157 = vmatprep.subr.mxu0 %v510_v10  ;;  %2247 = vmatpush3.msra.mxu1 %v509_v12  ;;  %v52_v33 = vld [vmem:[%s3768_s0 + $0xa8] sm:$0xff]  ;;  %v53_v34 = vld [vmem:[%s3768_s0 + $0xb0] sm:$0xff]  ;;  %v54_v35 = vld [vmem:[%s3768_s0 + $0xb8] sm:$0xff] }
   0xd   :  { %2158 = vmatpush3.msra.mxu0 %v510_v10  ;;  %2240 = vmatprep.subr.mxu1 %v508_v14  ;;  %v55_v36 = vld [vmem:[%s3768_s0 + $0xc0] sm:$0xff]  ;;  %v56_v37 = vld [vmem:[%s3768_s0 + $0xc8] sm:$0xff]  ;;  %v57_v38 = vld [vmem:[%s3768_s0 + $0xd0] sm:$0xff] }
   0xe   :  { %2093 = vmatmul.mubr.msk.f32.gmra.mxu0 %vm86_vm0, %v34_v7  ;;  %2159 = vmatprep.subr.mxu0 %v509_v12  ;;  %v58_v39 = vld [vmem:[%s3768_s0 + $0xd8] sm:$0xff]  ;;  %v59_v40 = vld [vmem:[%s3768_s0 + $0xe0] sm:$0xff]  ;;  %v60_v41 = vld [vmem:[%s3768_s0 + $0xe8] sm:$0xff] }
   0xf   :  { %2095 = vmatprep.mubr.msk.f32.mxu0 %vm86_vm0, %v35_v8  ;;  %2160 = vmatpush3.msra.mxu0 %v509_v12  ;;  %v61_v42 = vld [vmem:[%s3768_s0 + $0xf0] sm:$0xff]  ;;  %v62_v43 = vld [vmem:[%s3768_s0 + $0xf8] sm:$0xff]  ;;  %v63_v44 = vld [vmem:[%s3768_s0 + $0x100] sm:$0xff] }
  0x10   :  { %2161 = vmatprep.subr.mxu0 %v508_v14  ;;  %2248 = vmatpush3.msra.mxu1 %v508_v14  ;;  %v64_v45 = vld [vmem:[%s3768_s0 + $0x108] sm:$0xff]  ;;  %v65_v46 = vld [vmem:[%s3768_s0 + $0x110] sm:$0xff]  ;;  %v66_v47 = vld [vmem:[%s3768_s0 + $0x118] sm:$0xff] }
  0x11   :  { %2162 = vmatpush3.msra.mxu0 %v508_v14  ;;  %2241 = vmatprep.subr.mxu1 %v507_v16  ;;  %v67_v48 = vld [vmem:[%s3768_s0 + $0x120] sm:$0xff]  ;;  %v68_v49 = vld [vmem:[%s3768_s0 + $0x128] sm:$0xff]  ;;  %v69_v50 = vld [vmem:[%s3768_s0 + $0x130] sm:$0xff] }
  0x12   :  { %2096 = vmatmul.mubr.msk.f32.gmra.mxu0 %vm86_vm0, %v36_v11  ;;  %2163 = vmatprep.subr.mxu0 %v507_v16  ;;  %v70_v51 = vld [vmem:[%s3768_s0 + $0x138] sm:$0xff]  ;;  %v71_v52 = vld [vmem:[%s3768_s0 + $0x140] sm:$0xff]  ;;  %v72_v53 = vld [vmem:[%s3768_s0 + $0x148] sm:$0xff] }
  0x13   :  { %2098 = vmatprep.mubr.msk.f32.mxu0 %vm86_vm0, %v37_v13  ;;  %2164 = vmatpush3.msra.mxu0 %v507_v16  ;;  %v73_v54 = vld [vmem:[%s3768_s0 + $0x150] sm:$0xff]  ;;  %v74_v55 = vld [vmem:[%s3768_s0 + $0x158] sm:$0xff]  ;;  %v2606_v57 = vld [vmem:[%s3770_s2] ss:$0 sm:$0xff] }
  0x14   :  { %2165 = vmatprep.subr.mxu0 %v506_v18  ;;  %2249 = vmatpush3.msra.mxu1 %v507_v16 }
  0x15   :  { %2166 = vmatpush3.msra.mxu0 %v506_v18  ;;  %2242 = vmatprep.subr.mxu1 %v506_v18 }
  0x16   :  { %2099 = vmatmul.mubr.msk.f32.gmra.mxu0 %vm86_vm0, %v38_v15  ;;  %2167 = vmatprep.subr.mxu0 %v505_v20 }
  0x17   :  { %2101 = vmatprep.mubr.msk.f32.mxu0 %vm86_vm0, %v39_v17  ;;  %2168 = vmatpush3.msra.mxu0 %v505_v20 }
  0x18   :  { %2169 = vmatprep.subr.mxu0 %v504_v22  ;;  %2250 = vmatpush3.msra.mxu1 %v506_v18 }
  0x19   :  { %2170 = vmatpush3.msra.mxu0 %v504_v22  ;;  %2243 = vmatprep.subr.mxu1 %v505_v20 }
  0x1a   :  { %2102 = vmatmul.mubr.msk.f32.gmra.mxu0 %vm86_vm0, %v40_v19  ;;  %2251 = vmatpush3.msra.mxu1 %v505_v20 }
  0x1b   :  { %2104 = vmatprep.mubr.msk.f32.mxu0 %vm86_vm0, %v41_v21  ;;  %2244 = vmatprep.subr.mxu1 %v504_v22 }
  0x1c   :  { %2252 = vmatpush3.msra.mxu1 %v504_v22 }
  0x1e   :  { %2105 = vmatmul.mubr.msk.f32.gmra.mxu0 %vm86_vm0, %v42_v23 }
  0x1f   :  { %2107 = vmatprep.mubr.msk.f32.mxu0 %vm86_vm0, %v43_v24 }
  0x22   :  { %2108 = vmatmul.mubr.msk.f32.gmra.mxu0 %vm86_vm0, %v44_v25 }
  0x23   :  { %2110 = vmatprep.mubr.msk.f32.mxu0 %vm86_vm0, %v45_v26 }
  0x26   :  { %2111 = vmatmul.mubr.msk.f32.gmra.mxu0 %vm86_vm0, %v46_v27 }
  0x27   :  { %2113 = vmatprep.mubr.msk.f32.mxu0 %vm86_vm0, %v47_v28 }
  0x2a   :  { %2114 = vmatmul.mubr.msk.f32.gmra.mxu0 %vm86_vm0, %v48_v29 }
  0x2b   :  { %2116 = vmatprep.mubr.msk.f32.mxu0 %vm86_vm0, %v49_v30 }
  0x2e   :  { %2117 = vmatmul.mubr.msk.f32.gmra.mxu0 %vm86_vm0, %v50_v31 }
  0x2f   :  { %2119 = vmatprep.mubr.msk.f32.mxu0 %vm86_vm0, %v51_v32 }
  0x32   :  { %2120 = vmatmul.mubr.msk.f32.gmra.mxu0 %vm86_vm0, %v52_v33 }
  0x33   :  { %2122 = vmatprep.mubr.msk.f32.mxu0 %vm86_vm0, %v53_v34 }
  0x36   :  { %2123 = vmatmul.mubr.msk.f32.gmra.mxu0 %vm86_vm0, %v54_v35 }
  0x37   :  { %2125 = vmatprep.mubr.msk.f32.mxu0 %vm86_vm0, %v55_v36 }
  0x3a   :  { %2126 = vmatmul.mubr.msk.f32.gmra.mxu0 %vm86_vm0, %v56_v37 }
  0x3b   :  { %2128 = vmatprep.mubr.msk.f32.mxu0 %vm86_vm0, %v57_v38 }
  0x3e   :  { %2129 = vmatmul.mubr.msk.f32.gmra.mxu0 %vm86_vm0, %v58_v39 }
  0x3f   :  { %2131 = vmatprep.mubr.msk.f32.mxu0 %vm86_vm0, %v59_v40 }
  0x42   :  { %2132 = vmatmul.mubr.msk.f32.gmra.mxu0 %vm86_vm0, %v60_v41 }
  0x43   :  { %2134 = vmatprep.mubr.msk.f32.mxu0 %vm86_vm0, %v61_v42 }
  0x46   :  { %2135 = vmatmul.mubr.msk.f32.gmra.mxu0 %vm86_vm0, %v62_v43 }
  0x47   :  { %2137 = vmatprep.mubr.msk.f32.mxu0 %vm86_vm0, %v63_v44 }
  0x4a   :  { %2138 = vmatmul.mubr.msk.f32.gmra.mxu0 %vm86_vm0, %v64_v45 }
  0x4b   :  { %2140 = vmatprep.mubr.msk.f32.mxu0 %vm86_vm0, %v65_v46 }
  0x4e   :  { %2141 = vmatmul.mubr.msk.f32.gmra.mxu0 %vm86_vm0, %v66_v47 }
  0x4f   :  { %2143 = vmatprep.mubr.msk.f32.mxu0 %vm86_vm0, %v67_v48 }
  0x52   :  { %2144 = vmatmul.mubr.msk.f32.gmra.mxu0 %vm86_vm0, %v68_v49 }
  0x53   :  { %2146 = vmatprep.mubr.msk.f32.mxu0 %vm86_vm0, %v69_v50 }
  0x56   :  { %2147 = vmatmul.mubr.msk.f32.gmra.mxu0 %vm86_vm0, %v70_v51 }
  0x57   :  { %2149 = vmatprep.mubr.msk.f32.mxu0 %vm86_vm0, %v71_v52 }
  0x5a   :  { %2150 = vmatmul.mubr.msk.f32.gmra.mxu0 %vm86_vm0, %v72_v53 }
  0x5b   :  { %2152 = vmatprep.mubr.msk.f32.mxu0 %vm86_vm0, %v73_v54 }
  0x5e   :  { %2153 = vmatmul.mubr.msk.f32.gmra.mxu0 %vm86_vm0, %v74_v55 }
  0xca   :  { %v2091_v56 = vpop.f32.mrf.mxu0 }
  0xcb   :  { %v291_v60 = vadd.f32 %v2091_v56, %v2606_v57 }
  0xcc   :  { %v285_v58 = vpop.f32.mrf.mxu0 }
  0xcd   :  { %v286_v59 = vadd.f32 %v2606_v57, %v285_v58 }
  0xce   :  { %v2094_v61 = vpop.f32.mrf.mxu0 }
  0xcf   :  { %2171 = vmatprep.mubr.msk.f32.mxu0 %vm519_vm1, %v286_v59  ;;  %v301_v62 = vadd.f32 %v2094_v61, %v2606_v57 }
  0xd0   :  { %v295_v63 = vpop.f32.mrf.mxu0  ;;  %2172 = vmatmul.mubr.msk.f32.vlgmr.msra.gmra.mxu0 %vm519_vm1, %v291_v60 }
  0xd1   :  { %v296_v0 = vadd.f32 %v2606_v57, %v295_v63 }
  0xd2   :  { %v2097_v1 = vpop.f32.mrf.mxu0 }
  0xd3   :  { %2174 = vmatprep.mubr.msk.f32.mxu1 %vm519_vm1, %v296_v0  ;;  %v311_v2 = vadd.f32 %v2097_v1, %v2606_v57 }
  0xd4   :  { %2175 = vmatmul.mubr.msk.f32.vlgmr.msra.gmra.mxu1 %vm519_vm1, %v301_v62  ;;  %v305_v3 = vpop.f32.mrf.mxu0 }
  0xd5   :  { %v306_v4 = vadd.f32 %v2606_v57, %v305_v3 }
  0xd6   :  { %v2100_v5 = vpop.f32.mrf.mxu0 }
  0xd7   :  { %2177 = vmatprep.mubr.msk.f32.mxu1 %vm519_vm1, %v306_v4  ;;  %v321_v6 = vadd.f32 %v2100_v5, %v2606_v57 }
  0xd8   :  { %2178 = vmatmul.mubr.msk.f32.gmra.mxu1 %vm519_vm1, %v311_v2  ;;  %v315_v7 = vpop.f32.mrf.mxu0 }
  0xd9   :  { %v316_v8 = vadd.f32 %v2606_v57, %v315_v7 }
  0xda   :  { %v2103_v9 = vpop.f32.mrf.mxu0 }
  0xdb   :  { %2180 = vmatprep.mubr.msk.f32.mxu1 %vm519_vm1, %v316_v8  ;;  %v331_v10 = vadd.f32 %v2103_v9, %v2606_v57 }
  0xdc   :  { %2181 = vmatmul.mubr.msk.f32.gmra.mxu1 %vm519_vm1, %v321_v6  ;;  %v325_v11 = vpop.f32.mrf.mxu0 }
  0xdd   :  { %v326_v12 = vadd.f32 %v2606_v57, %v325_v11 }
  0xde   :  { %v2106_v13 = vpop.f32.mrf.mxu0 }
  0xdf   :  { %2183 = vmatprep.mubr.msk.f32.mxu1 %vm519_vm1, %v326_v12  ;;  %v341_v14 = vadd.f32 %v2106_v13, %v2606_v57 }
  0xe0   :  { %2184 = vmatmul.mubr.msk.f32.gmra.mxu1 %vm519_vm1, %v331_v10  ;;  %v335_v15 = vpop.f32.mrf.mxu0 }
  0xe1   :  { %v336_v16 = vadd.f32 %v2606_v57, %v335_v15 }
  0xe2   :  { %v2109_v17 = vpop.f32.mrf.mxu0 }
  0xe3   :  { %2186 = vmatprep.mubr.msk.f32.mxu1 %vm519_vm1, %v336_v16  ;;  %v351_v18 = vadd.f32 %v2109_v17, %v2606_v57 }
  0xe4   :  { %2187 = vmatmul.mubr.msk.f32.gmra.mxu1 %vm519_vm1, %v341_v14  ;;  %v345_v19 = vpop.f32.mrf.mxu0 }
  0xe5   :  { %v346_v20 = vadd.f32 %v2606_v57, %v345_v19 }
  0xe6   :  { %v2112_v21 = vpop.f32.mrf.mxu0 }
  0xe7   :  { %2189 = vmatprep.mubr.msk.f32.mxu1 %vm519_vm1, %v346_v20  ;;  %v361_v22 = vadd.f32 %v2112_v21, %v2606_v57  ;;  %v2704_v20 = vld [vmem:[%s3772_s5] ss:$0 sm:$0xff] }
  0xe8   :  { %2190 = vmatmul.mubr.msk.f32.gmra.mxu1 %vm519_vm1, %v351_v18  ;;  %v355_v23 = vpop.f32.mrf.mxu0  ;;  %v2699_v18 = vld [vmem:[%s3771_s4] ss:$0 sm:$0xff] }
  0xe9   :  { %v356_v24 = vadd.f32 %v2606_v57, %v355_v23 }
  0xea   :  { %v2115_v25 = vpop.f32.mrf.mxu0 }
  0xeb   :  { %2192 = vmatprep.mubr.msk.f32.mxu1 %vm519_vm1, %v356_v24  ;;  %v371_v26 = vadd.f32 %v2115_v25, %v2606_v57 }
  0xec   :  { %2193 = vmatmul.mubr.msk.f32.gmra.mxu1 %vm519_vm1, %v361_v22  ;;  %v365_v27 = vpop.f32.mrf.mxu0 }
  0xed   :  { %v366_v28 = vadd.f32 %v2606_v57, %v365_v27 }
  0xee   :  { %v2118_v29 = vpop.f32.mrf.mxu0 }
  0xef   :  { %2195 = vmatprep.mubr.msk.f32.mxu1 %vm519_vm1, %v366_v28  ;;  %v381_v30 = vadd.f32 %v2118_v29, %v2606_v57 }
  0xf0   :  { %2196 = vmatmul.mubr.msk.f32.gmra.mxu1 %vm519_vm1, %v371_v26  ;;  %v375_v31 = vpop.f32.mrf.mxu0 }
  0xf1   :  { %v376_v32 = vadd.f32 %v2606_v57, %v375_v31 }
  0xf2   :  { %v2121_v33 = vpop.f32.mrf.mxu0 }
  0xf3   :  { %2198 = vmatprep.mubr.msk.f32.mxu1 %vm519_vm1, %v376_v32  ;;  %v391_v34 = vadd.f32 %v2121_v33, %v2606_v57 }
  0xf4   :  { %2199 = vmatmul.mubr.msk.f32.gmra.mxu1 %vm519_vm1, %v381_v30  ;;  %v385_v35 = vpop.f32.mrf.mxu0 }
  0xf5   :  { %v386_v36 = vadd.f32 %v2606_v57, %v385_v35 }
  0xf6   :  { %v2124_v37 = vpop.f32.mrf.mxu0 }
  0xf7   :  { %2201 = vmatprep.mubr.msk.f32.mxu1 %vm519_vm1, %v386_v36  ;;  %v401_v38 = vadd.f32 %v2124_v37, %v2606_v57 }
  0xf8   :  { %2202 = vmatmul.mubr.msk.f32.gmra.mxu1 %vm519_vm1, %v391_v34  ;;  %v395_v39 = vpop.f32.mrf.mxu0  ;;  %v15_v34 = vstv %s3774_s6 }
  0xf9   :  { %v396_v40 = vadd.f32 %v2606_v57, %v395_v39  ;;  %16 = vst [vmem:[#allocation2] sm:$0x1] %v15_v34 }
  0xfa   :  { %v2127_v41 = vpop.f32.mrf.mxu0 }
  0xfb   :  { %2204 = vmatprep.mubr.msk.f32.mxu1 %vm519_vm1, %v396_v40  ;;  %v411_v42 = vadd.f32 %v2127_v41, %v2606_v57 }
  0xfc   :  { %2205 = vmatmul.mubr.msk.f32.gmra.mxu1 %vm519_vm1, %v401_v38  ;;  %v405_v43 = vpop.f32.mrf.mxu0 }
  0xfd   :  { %v406_v44 = vadd.f32 %v2606_v57, %v405_v43 }
  0xfe   :  { %v2130_v45 = vpop.f32.mrf.mxu0 }
  0xff   :  { %2207 = vmatprep.mubr.msk.f32.mxu1 %vm519_vm1, %v406_v44  ;;  %v421_v46 = vadd.f32 %v2130_v45, %v2606_v57 }
 0x100   :  { %2208 = vmatmul.mubr.msk.f32.gmra.mxu1 %vm519_vm1, %v411_v42  ;;  %v415_v47 = vpop.f32.mrf.mxu0 }
 0x101   :  { %v416_v48 = vadd.f32 %v2606_v57, %v415_v47 }
 0x102   :  { %v2133_v49 = vpop.f32.mrf.mxu0 }
 0x103   :  { %2210 = vmatprep.mubr.msk.f32.mxu1 %vm519_vm1, %v416_v48  ;;  %v431_v50 = vadd.f32 %v2133_v49, %v2606_v57 }
 0x104   :  { %2211 = vmatmul.mubr.msk.f32.gmra.mxu1 %vm519_vm1, %v421_v46  ;;  %v425_v51 = vpop.f32.mrf.mxu0 }
 0x105   :  { %v426_v52 = vadd.f32 %v2606_v57, %v425_v51 }
 0x106   :  { %v2136_v53 = vpop.f32.mrf.mxu0 }
 0x107   :  { %2213 = vmatprep.mubr.msk.f32.mxu1 %vm519_vm1, %v426_v52  ;;  %v441_v54 = vadd.f32 %v2136_v53, %v2606_v57 }
 0x108   :  { %2214 = vmatmul.mubr.msk.f32.gmra.mxu1 %vm519_vm1, %v431_v50  ;;  %v435_v55 = vpop.f32.mrf.mxu0 }
 0x109   :  { %v436_v56 = vadd.f32 %v2606_v57, %v435_v55 }
 0x10a   :  { %v2139_v58 = vpop.f32.mrf.mxu0 }
 0x10b   :  { %2216 = vmatprep.mubr.msk.f32.mxu1 %vm519_vm1, %v436_v56  ;;  %v451_v59 = vadd.f32 %v2139_v58, %v2606_v57 }
 0x10c   :  { %2217 = vmatmul.mubr.msk.f32.gmra.mxu1 %vm519_vm1, %v441_v54  ;;  %v445_v60 = vpop.f32.mrf.mxu0 }
 0x10d   :  { %v446_v61 = vadd.f32 %v2606_v57, %v445_v60 }
 0x10e   :  { %v2142_v62 = vpop.f32.mrf.mxu0 }
 0x10f   :  { %2219 = vmatprep.mubr.msk.f32.mxu1 %vm519_vm1, %v446_v61  ;;  %v461_v63 = vadd.f32 %v2142_v62, %v2606_v57 }
 0x110   :  { %2220 = vmatmul.mubr.msk.f32.gmra.mxu1 %vm519_vm1, %v451_v59  ;;  %v455_v0 = vpop.f32.mrf.mxu0 }
 0x111   :  { %v456_v1 = vadd.f32 %v2606_v57, %v455_v0 }
 0x112   :  { %v2145_v2 = vpop.f32.mrf.mxu0 }
 0x113   :  { %2222 = vmatprep.mubr.msk.f32.mxu1 %vm519_vm1, %v456_v1  ;;  %v471_v3 = vadd.f32 %v2145_v2, %v2606_v57 }
 0x114   :  { %2223 = vmatmul.mubr.msk.f32.gmra.mxu1 %vm519_vm1, %v461_v63  ;;  %v465_v4 = vpop.f32.mrf.mxu0 }
 0x115   :  { %v466_v5 = vadd.f32 %v2606_v57, %v465_v4 }
 0x116   :  { %v2148_v6 = vpop.f32.mrf.mxu0 }
 0x117   :  { %2225 = vmatprep.mubr.msk.f32.mxu1 %vm519_vm1, %v466_v5  ;;  %v481_v7 = vadd.f32 %v2148_v6, %v2606_v57 }
 0x118   :  { %2226 = vmatmul.mubr.msk.f32.gmra.mxu1 %vm519_vm1, %v471_v3  ;;  %v475_v8 = vpop.f32.mrf.mxu0 }
 0x119   :  { %v476_v9 = vadd.f32 %v2606_v57, %v475_v8 }
 0x11a   :  { %v2151_v10 = vpop.f32.mrf.mxu0 }
 0x11b   :  { %2228 = vmatprep.mubr.msk.f32.mxu1 %vm519_vm1, %v476_v9  ;;  %v491_v11 = vadd.f32 %v2151_v10, %v2606_v57 }
 0x11c   :  { %2229 = vmatmul.mubr.msk.f32.gmra.mxu1 %vm519_vm1, %v481_v7  ;;  %v485_v12 = vpop.f32.mrf.mxu0 }
 0x11d   :  { %v486_v13 = vadd.f32 %v2606_v57, %v485_v12 }
 0x11e   :  { %v2154_v14 = vpop.f32.mrf.mxu0 }
 0x11f   :  { %2231 = vmatprep.mubr.msk.f32.mxu1 %vm519_vm1, %v486_v13  ;;  %v501_v15 = vadd.f32 %v2154_v14, %v2606_v57 }
 0x120   :  { %2232 = vmatmul.mubr.msk.f32.gmra.mxu1 %vm519_vm1, %v491_v11  ;;  %v495_v16 = vpop.f32.mrf.mxu0 }
 0x121   :  { %v496_v17 = vadd.f32 %v2606_v57, %v495_v16 }
 0x123   :  { %2234 = vmatprep.mubr.msk.f32.mxu1 %vm519_vm1, %v496_v17 }
 0x124   :  { %2235 = vmatmul.mubr.msk.f32.gmra.mxu1 %vm519_vm1, %v501_v15 }
 0x190   :  { %v2173_v19 = vpop.f32.mrf.mxu0 }
 0x191   :  { %v2707_v21 = vadd.f32 %v2173_v19, %v2699_v18 }
 0x192   :  { %v718_v22 = vpop.f32.mrf.mxu0 }
 0x193   :  { %1746 = vst.msk [vmem:[%s3773_s7 + $0x8] sm:$0xff] %vm519_vm1, %v2707_v21  ;;  %v2715_v57 = vadd.f32 %v2699_v18, %v718_v22  ;;  %v945_v23 = vmul.f32 %v2704_v20, %v2707_v21  ;;  %v1217_v28 = vmul.f32 %v2707_v21, %v2707_v21 }
 0x194   :  { %v2176_v24 = vpop.f32.mrf.mxu1 }
 0x195   :  { %1745 = vst.msk [vmem:[%s3773_s7] sm:$0xff] %vm519_vm1, %v2715_v57  ;;  %v2725_v25 = vadd.f32 %v2176_v24, %v2699_v18  ;;  %v991_v26 = vsel %vm519_vm1, %v945_v23, 0.0  ;;  %v1216_v27 = vmul.f32 %v2715_v57, %v2715_v57  ;;  %v1263_v35 = vsel %vm519_vm1, %v1217_v28, 0.0 }
 0x196   :  { %v728_v29 = vpop.f32.mrf.mxu1  ;;  %992 = vadd.xlane.f32.xlu0 %v991_v26  ;;  %v944_v38 = vmul.f32 %v2704_v20, %v2715_v57 }
 0x197   :  { %1748 = vst.msk [vmem:[%s3773_s7 + $0x18] sm:$0xff] %vm519_vm1, %v2725_v25  ;;  %v2738_v30 = vadd.f32 %v2699_v18, %v728_v29  ;;  %v1260_v31 = vsel %vm519_vm1, %v1216_v27, 0.0  ;;  %v947_v32 = vmul.f32 %v2704_v20, %v2725_v25  ;;  %v1219_v44 = vmul.f32 %v2725_v25, %v2725_v25 }
 0x198   :  { %1261 = vadd.xlane.f32.xlu1 %v1260_v31  ;;  %v2179_v33 = vpop.f32.mrf.mxu1  ;;  %v988_v43 = vsel %vm519_vm1, %v944_v38, 0.0 }
 0x199   :  { %1747 = vst.msk [vmem:[%s3773_s7 + $0x10] sm:$0xff] %vm519_vm1, %v2738_v30  ;;  %v2753_v36 = vadd.f32 %v2179_v33, %v2699_v18  ;;  %v997_v37 = vsel %vm519_vm1, %v947_v32, 0.0  ;;  %v946_v41 = vmul.f32 %v2704_v20, %v2738_v30  ;;  %v1218_v48 = vmul.f32 %v2738_v30, %v2738_v30 }
 0x19a   :  { %1264 = vadd.xlane.f32.xlu0 %v1263_v35  ;;  %v738_v39 = vpop.f32.mrf.mxu1  ;;  %v1269_v51 = vsel %vm519_vm1, %v1219_v44, 0.0 }
 0x19b   :  { %1750 = vst.msk [vmem:[%s3773_s7 + $0x28] sm:$0xff] %vm519_vm1, %v2753_v36  ;;  %v2764_v40 = vadd.f32 %v2699_v18, %v738_v39  ;;  %v994_v47 = vsel %vm519_vm1, %v946_v41, 0.0  ;;  %v1221_v52 = vmul.f32 %v2753_v36, %v2753_v36  ;;  %v1266_v55 = vsel %vm519_vm1, %v1218_v48, 0.0 }
 0x19c   :  { %998 = vadd.xlane.f32.xlu1 %v997_v37  ;;  %v2182_v42 = vpop.f32.mrf.mxu1  ;;  %v949_v56 = vmul.f32 %v2704_v20, %v2753_v36 }
 0x19d   :  { %1749 = vst.msk [vmem:[%s3773_s7 + $0x20] sm:$0xff] %vm519_vm1, %v2764_v40  ;;  %v2777_v45 = vadd.f32 %v2182_v42, %v2699_v18  ;;  %v1275_v60 = vsel %vm519_vm1, %v1221_v52, 0.0  ;;  %v948_v61 = vmul.f32 %v2704_v20, %v2764_v40  ;;  %v1220_v1 = vmul.f32 %v2764_v40, %v2764_v40 }
 0x19e   :  { %989 = vadd.xlane.f32.xlu0 %v988_v43  ;;  %v748_v46 = vpop.f32.mrf.mxu1  ;;  %v1003_v0 = vsel %vm519_vm1, %v949_v56, 0.0 }
 0x19f   :  { %1752 = vst.msk [vmem:[%s3773_s7 + $0x38] sm:$0xff] %vm519_vm1, %v2777_v45  ;;  %v2788_v49 = vadd.f32 %v2699_v18, %v748_v46  ;;  %v1000_v4 = vsel %vm519_vm1, %v948_v61, 0.0  ;;  %v1223_v5 = vmul.f32 %v2777_v45, %v2777_v45  ;;  %v1272_v8 = vsel %vm519_vm1, %v1220_v1, 0.0 }
 0x1a0   :  { %995 = vadd.xlane.f32.xlu1 %v994_v47  ;;  %v2185_v50 = vpop.f32.mrf.mxu1  ;;  %v951_v9 = vmul.f32 %v2704_v20, %v2777_v45 }
 0x1a1   :  { %1751 = vst.msk [vmem:[%s3773_s7 + $0x30] sm:$0xff] %vm519_vm1, %v2788_v49  ;;  %v2799_v53 = vadd.f32 %v2185_v50, %v2699_v18  ;;  %v1281_v12 = vsel %vm519_vm1, %v1223_v5, 0.0  ;;  %v950_v13 = vmul.f32 %v2704_v20, %v2788_v49  ;;  %v1222_v17 = vmul.f32 %v2788_v49, %v2788_v49 }
 0x1a2   :  { %1270 = vadd.xlane.f32.xlu0 %v1269_v51  ;;  %v758_v54 = vpop.f32.mrf.mxu1  ;;  %v1009_v16 = vsel %vm519_vm1, %v951_v9, 0.0 }
 0x1a3   :  { %1754 = vst.msk [vmem:[%s3773_s7 + $0x48] sm:$0xff] %vm519_vm1, %v2799_v53  ;;  %v2810_v58 = vadd.f32 %v2699_v18, %v758_v54  ;;  %v1006_v23 = vsel %vm519_vm1, %v950_v13, 0.0  ;;  %v1225_v24 = vmul.f32 %v2799_v53, %v2799_v53  ;;  %v1278_v28 = vsel %vm519_vm1, %v1222_v17, 0.0 }
 0x1a4   :  { %1267 = vadd.xlane.f32.xlu1 %v1266_v55  ;;  %v2188_v59 = vpop.f32.mrf.mxu1  ;;  %v953_v29 = vmul.f32 %v2704_v20, %v2799_v53 }
 0x1a5   :  { %1753 = vst.msk [vmem:[%s3773_s7 + $0x40] sm:$0xff] %vm519_vm1, %v2810_v58  ;;  %v2821_v62 = vadd.f32 %v2188_v59, %v2699_v18  ;;  %v1287_v33 = vsel %vm519_vm1, %v1225_v24, 0.0  ;;  %v952_v34 = vmul.f32 %v2704_v20, %v2810_v58  ;;  %v1224_v39 = vmul.f32 %v2810_v58, %v2810_v58 }
 0x1a6   :  { %1276 = vadd.xlane.f32.xlu0 %v1275_v60  ;;  %v768_v63 = vpop.f32.mrf.mxu1  ;;  %v1015_v38 = vsel %vm519_vm1, %v953_v29, 0.0 }
 0x1a7   :  { %1756 = vst.msk [vmem:[%s3773_s7 + $0x58] sm:$0xff] %vm519_vm1, %v2821_v62  ;;  %v2832_v2 = vadd.f32 %v2699_v18, %v768_v63  ;;  %v1012_v43 = vsel %vm519_vm1, %v952_v34, 0.0  ;;  %v1227_v44 = vmul.f32 %v2821_v62, %v2821_v62  ;;  %v1284_v48 = vsel %vm519_vm1, %v1224_v39, 0.0 }
 0x1a8   :  { %1004 = vadd.xlane.f32.xlu1 %v1003_v0  ;;  %v2191_v3 = vpop.f32.mrf.mxu1  ;;  %v955_v50 = vmul.f32 %v2704_v20, %v2821_v62 }
 0x1a9   :  { %1755 = vst.msk [vmem:[%s3773_s7 + $0x50] sm:$0xff] %vm519_vm1, %v2832_v2  ;;  %v2843_v6 = vadd.f32 %v2191_v3, %v2699_v18  ;;  %v1293_v54 = vsel %vm519_vm1, %v1227_v44, 0.0  ;;  %v954_v55 = vmul.f32 %v2704_v20, %v2832_v2  ;;  %v1226_v61 = vmul.f32 %v2832_v2, %v2832_v2 }
 0x1aa   :  { %1001 = vadd.xlane.f32.xlu0 %v1000_v4  ;;  %v778_v7 = vpop.f32.mrf.mxu1  ;;  %v1021_v60 = vsel %vm519_vm1, %v955_v50, 0.0 }
 0x1ab   :  { %1758 = vst.msk [vmem:[%s3773_s7 + $0x68] sm:$0xff] %vm519_vm1, %v2843_v6  ;;  %v2854_v10 = vadd.f32 %v2699_v18, %v778_v7  ;;  %v1018_v1 = vsel %vm519_vm1, %v954_v55, 0.0  ;;  %v1229_v3 = vmul.f32 %v2843_v6, %v2843_v6  ;;  %v1290_v7 = vsel %vm519_vm1, %v1226_v61, 0.0 }
 0x1ac   :  { %1273 = vadd.xlane.f32.xlu1 %v1272_v8  ;;  %v2194_v11 = vpop.f32.mrf.mxu1  ;;  %v957_v8 = vmul.f32 %v2704_v20, %v2843_v6 }
 0x1ad   :  { %1757 = vst.msk [vmem:[%s3773_s7 + $0x60] sm:$0xff] %vm519_vm1, %v2854_v10  ;;  %v2865_v14 = vadd.f32 %v2194_v11, %v2699_v18  ;;  %v956_v13 = vmul.f32 %v2704_v20, %v2854_v10 }
 0x1ae   :  { %1282 = vadd.xlane.f32.xlu0 %v1281_v12  ;;  %v788_v15 = vpop.f32.mrf.mxu1  ;;  %v1299_v12 = vsel %vm519_vm1, %v1229_v3, 0.0  ;;  %v1027_v17 = vsel %vm519_vm1, %v957_v8, 0.0 }
 0x1af   :  { %1760 = vst.msk [vmem:[%s3773_s7 + $0x78] sm:$0xff] %vm519_vm1, %v2865_v14  ;;  %v2876_v19 = vadd.f32 %v2699_v18, %v788_v15  ;;  %v959_v34 = vmul.f32 %v2704_v20, %v2865_v14 }
 0x1b0   :  { %1010 = vadd.xlane.f32.xlu1 %v1009_v16  ;;  %v2197_v22 = vpop.f32.mrf.mxu1 }
 0x1b1   :  { %1759 = vst.msk [vmem:[%s3773_s7 + $0x70] sm:$0xff] %vm519_vm1, %v2876_v19  ;;  %v2887_v26 = vadd.f32 %v2197_v22, %v2699_v18  ;;  %v1228_v22 = vmul.f32 %v2854_v10, %v2854_v10 }
 0x1b2   :  { %1007 = vadd.xlane.f32.xlu0 %v1006_v23  ;;  %v798_v27 = vpop.f32.mrf.mxu1 }
 0x1b3   :  { %1762 = vst.msk [vmem:[%s3773_s7 + $0x88] sm:$0xff] %vm519_vm1, %v2887_v26  ;;  %v2898_v31 = vadd.f32 %v2699_v18, %v798_v27  ;;  %v1024_v27 = vsel %vm519_vm1, %v956_v13, 0.0  ;;  %v1233_v55 = vmul.f32 %v2887_v26, %v2887_v26 }
 0x1b4   :  { %1279 = vadd.xlane.f32.xlu1 %v1278_v28  ;;  %v2200_v32 = vpop.f32.mrf.mxu1  ;;  %v1231_v28 = vmul.f32 %v2865_v14, %v2865_v14 }
 0x1b5   :  { %1761 = vst.msk [vmem:[%s3773_s7 + $0x80] sm:$0xff] %vm519_vm1, %v2898_v31  ;;  %v2909_v35 = vadd.f32 %v2200_v32, %v2699_v18  ;;  %v1232_v13 = vmul.f32 %v2898_v31, %v2898_v31 }
 0x1b6   :  { %1288 = vadd.xlane.f32.xlu0 %v1287_v33  ;;  %v808_v37 = vpop.f32.mrf.mxu1  ;;  %v1296_v33 = vsel %vm519_vm1, %v1228_v22, 0.0  ;;  %v1305_v39 = vsel %vm519_vm1, %v1231_v28, 0.0 }
 0x1b7   :  { %1764 = vst.msk [vmem:[%s3773_s7 + $0x98] sm:$0xff] %vm519_vm1, %v2909_v35  ;;  %v2920_v41 = vadd.f32 %v2699_v18, %v808_v37 }
 0x1b8   :  { %1016 = vadd.xlane.f32.xlu1 %v1015_v38  ;;  %v2203_v42 = vpop.f32.mrf.mxu1 }
 0x1b9   :  { %1763 = vst.msk [vmem:[%s3773_s7 + $0x90] sm:$0xff] %vm519_vm1, %v2920_v41  ;;  %v2931_v46 = vadd.f32 %v2203_v42, %v2699_v18  ;;  %v958_v42 = vmul.f32 %v2704_v20, %v2876_v19 }
 0x1ba   :  { %1013 = vadd.xlane.f32.xlu0 %v1012_v43  ;;  %v818_v47 = vpop.f32.mrf.mxu1 }
 0x1bb   :  { %1766 = vst.msk [vmem:[%s3773_s7 + $0xa8] sm:$0xff] %vm519_vm1, %v2931_v46  ;;  %v2942_v51 = vadd.f32 %v2699_v18, %v818_v47  ;;  %v1033_v47 = vsel %vm519_vm1, %v959_v34, 0.0 }
 0x1bc   :  { %1285 = vadd.xlane.f32.xlu1 %v1284_v48  ;;  %v2206_v52 = vpop.f32.mrf.mxu1  ;;  %v1230_v48 = vmul.f32 %v2876_v19, %v2876_v19 }
 0x1bd   :  { %1765 = vst.msk [vmem:[%s3773_s7 + $0xa0] sm:$0xff] %vm519_vm1, %v2942_v51  ;;  %v2953_v56 = vadd.f32 %v2206_v52, %v2699_v18 }
 0x1be   :  { %1294 = vadd.xlane.f32.xlu0 %v1293_v54  ;;  %v828_v59 = vpop.f32.mrf.mxu1  ;;  %v1030_v54 = vsel %vm519_vm1, %v958_v42, 0.0  ;;  %v1302_v61 = vsel %vm519_vm1, %v1230_v48, 0.0  ;;  %v962_v42 = vmul.f32 %v2704_v20, %v2920_v41 }
 0x1bf   :  { %1768 = vst.msk [vmem:[%s3773_s7 + $0xb8] sm:$0xff] %vm519_vm1, %v2953_v56  ;;  %v2964_v63 = vadd.f32 %v2699_v18, %v828_v59 }
 0x1c0   :  { %1022 = vadd.xlane.f32.xlu1 %v1021_v60  ;;  %v2209_v0 = vpop.f32.mrf.mxu1 }
 0x1c1   :  { %1767 = vst.msk [vmem:[%s3773_s7 + $0xb0] sm:$0xff] %vm519_vm1, %v2964_v63  ;;  %v2975_v4 = vadd.f32 %v2209_v0, %v2699_v18  ;;  %v961_v0 = vmul.f32 %v2704_v20, %v2887_v26 }
 0x1c2   :  { %1019 = vadd.xlane.f32.xlu0 %v1018_v1  ;;  %v838_v5 = vpop.f32.mrf.mxu1 }
 0x1c3   :  { %1770 = vst.msk [vmem:[%s3773_s7 + $0xc8] sm:$0xff] %vm519_vm1, %v2975_v4  ;;  %v2986_v9 = vadd.f32 %v2699_v18, %v838_v5  ;;  %v1311_v5 = vsel %vm519_vm1, %v1233_v55, 0.0 }
 0x1c4   :  { %1291 = vadd.xlane.f32.xlu1 %v1290_v7  ;;  %v2212_v11 = vpop.f32.mrf.mxu1  ;;  %v960_v7 = vmul.f32 %v2704_v20, %v2898_v31 }
 0x1c5   :  { %1769 = vst.msk [vmem:[%s3773_s7 + $0xc0] sm:$0xff] %vm519_vm1, %v2986_v9  ;;  %v2997_v15 = vadd.f32 %v2212_v11, %v2699_v18 }
 0x1c6   :  { %1300 = vadd.xlane.f32.xlu0 %v1299_v12  ;;  %v848_v16 = vpop.f32.mrf.mxu1  ;;  %v1039_v12 = vsel %vm519_vm1, %v961_v0, 0.0  ;;  %v1036_v22 = vsel %vm519_vm1, %v960_v7, 0.0  ;;  %v965_v7 = vmul.f32 %v2704_v20, %v2931_v46 }
 0x1c7   :  { %1772 = vst.msk [vmem:[%s3773_s7 + $0xd8] sm:$0xff] %vm519_vm1, %v2997_v15  ;;  %v3008_v23 = vadd.f32 %v2699_v18, %v848_v16 }
 0x1c8   :  { %1028 = vadd.xlane.f32.xlu1 %v1027_v17  ;;  %v2215_v24 = vpop.f32.mrf.mxu1 }
 0x1c9   :  { %1771 = vst.msk [vmem:[%s3773_s7 + $0xd0] sm:$0xff] %vm519_vm1, %v3008_v23  ;;  %v3019_v29 = vadd.f32 %v2215_v24, %v2699_v18  ;;  %v1235_v24 = vmul.f32 %v2909_v35, %v2909_v35 }
 0x1ca   :  { %1025 = vadd.xlane.f32.xlu0 %v1024_v27  ;;  %v858_v32 = vpop.f32.mrf.mxu1 }
 0x1cb   :  { %1774 = vst.msk [vmem:[%s3773_s7 + $0xe8] sm:$0xff] %vm519_vm1, %v3019_v29  ;;  %v3030_v37 = vadd.f32 %v2699_v18, %v858_v32  ;;  %v1308_v32 = vsel %vm519_vm1, %v1232_v13, 0.0 }
 0x1cc   :  { %1297 = vadd.xlane.f32.xlu1 %v1296_v33  ;;  %v2218_v38 = vpop.f32.mrf.mxu1  ;;  %v963_v33 = vmul.f32 %v2704_v20, %v2909_v35 }
 0x1cd   :  { %1773 = vst.msk [vmem:[%s3773_s7 + $0xe0] sm:$0xff] %vm519_vm1, %v3030_v37  ;;  %v3041_v43 = vadd.f32 %v2218_v38, %v2699_v18 }
 0x1ce   :  { %1306 = vadd.xlane.f32.xlu0 %v1305_v39  ;;  %v868_v44 = vpop.f32.mrf.mxu1  ;;  %v1317_v39 = vsel %vm519_vm1, %v1235_v24, 0.0  ;;  %v1045_v48 = vsel %vm519_vm1, %v963_v33, 0.0 }
 0x1cf   :  { %1776 = vst.msk [vmem:[%s3773_s7 + $0xf8] sm:$0xff] %vm519_vm1, %v3041_v43  ;;  %v3052_v50 = vadd.f32 %v2699_v18, %v868_v44 }
 0x1d0   :  { %1034 = vadd.xlane.f32.xlu1 %v1033_v47  ;;  %v2221_v52 = vpop.f32.mrf.mxu1 }
 0x1d1   :  { %1775 = vst.msk [vmem:[%s3773_s7 + $0xf0] sm:$0xff] %vm519_vm1, %v3052_v50  ;;  %v3063_v59 = vadd.f32 %v2221_v52, %v2699_v18  ;;  %v1234_v52 = vmul.f32 %v2920_v41, %v2920_v41 }
 0x1d2   :  { %1031 = vadd.xlane.f32.xlu0 %v1030_v54  ;;  %v878_v60 = vpop.f32.mrf.mxu1 }
 0x1d3   :  { %1778 = vst.msk [vmem:[%s3773_s7 + $0x108] sm:$0xff] %vm519_vm1, %v3063_v59  ;;  %v3074_v1 = vadd.f32 %v2699_v18, %v878_v60  ;;  %v1042_v60 = vsel %vm519_vm1, %v962_v42, 0.0 }
 0x1d4   :  { %1303 = vadd.xlane.f32.xlu1 %v1302_v61  ;;  %v2224_v3 = vpop.f32.mrf.mxu1  ;;  %v1237_v61 = vmul.f32 %v2931_v46, %v2931_v46 }
 0x1d5   :  { %1777 = vst.msk [vmem:[%s3773_s7 + $0x100] sm:$0xff] %vm519_vm1, %v3074_v1  ;;  %v3085_v8 = vadd.f32 %v2224_v3, %v2699_v18 }
 0x1d6   :  { %1312 = vadd.xlane.f32.xlu0 %v1311_v5  ;;  %v888_v11 = vpop.f32.mrf.mxu1  ;;  %v1314_v5 = vsel %vm519_vm1, %v1234_v52, 0.0  ;;  %v1323_v13 = vsel %vm519_vm1, %v1237_v61, 0.0  ;;  %v1241_v61 = vmul.f32 %v2975_v4, %v2975_v4 }
 0x1d7   :  { %1780 = vst.msk [vmem:[%s3773_s7 + $0x118] sm:$0xff] %vm519_vm1, %v3085_v8  ;;  %v3096_v16 = vadd.f32 %v2699_v18, %v888_v11 }
 0x1d8   :  { %1040 = vadd.xlane.f32.xlu1 %v1039_v12  ;;  %v2227_v17 = vpop.f32.mrf.mxu1 }
 0x1d9   :  { %1779 = vst.msk [vmem:[%s3773_s7 + $0x110] sm:$0xff] %vm519_vm1, %v3096_v16  ;;  %v3107_v27 = vadd.f32 %v2227_v17, %v2699_v18  ;;  %v964_v17 = vmul.f32 %v2704_v20, %v2942_v51 }
 0x1da   :  { %1037 = vadd.xlane.f32.xlu0 %v1036_v22  ;;  %v898_v28 = vpop.f32.mrf.mxu1 }
 0x1db   :  { %1782 = vst.msk [vmem:[%s3773_s7 + $0x128] sm:$0xff] %vm519_vm1, %v3107_v27  ;;  %v3118_v34 = vadd.f32 %v2699_v18, %v898_v28  ;;  %v1051_v28 = vsel %vm519_vm1, %v965_v7, 0.0  ;;  %v1335_v7 = vsel %vm519_vm1, %v1241_v61, 0.0 }
 0x1dc   :  { %1309 = vadd.xlane.f32.xlu1 %v1308_v32  ;;  %v2230_v38 = vpop.f32.mrf.mxu1  ;;  %v1236_v32 = vmul.f32 %v2942_v51, %v2942_v51 }
 0x1dd   :  { %1781 = vst.msk [vmem:[%s3773_s7 + $0x120] sm:$0xff] %vm519_vm1, %v3118_v34  ;;  %v3129_v44 = vadd.f32 %v2230_v38, %v2699_v18  ;;  %v1048_v38 = vsel %vm519_vm1, %v964_v17, 0.0  ;;  %v1240_v17 = vmul.f32 %v2986_v9, %v2986_v9 }
 0x1de   :  { %1318 = vadd.xlane.f32.xlu0 %v1317_v39  ;;  %v908_v47 = vpop.f32.mrf.mxu1  ;;  %v1239_v39 = vmul.f32 %v2953_v56, %v2953_v56  ;;  %v1320_v42 = vsel %vm519_vm1, %v1236_v32, 0.0 }
 0x1df   :  { %1784 = vst.msk [vmem:[%s3773_s7 + $0x138] sm:$0xff] %vm519_vm1, %v3129_v44  ;;  %v3140_v54 = vadd.f32 %v2699_v18, %v908_v47  ;;  %v967_v47 = vmul.f32 %v2704_v20, %v2953_v56  ;;  %v1332_v32 = vsel %vm519_vm1, %v1240_v17, 0.0 }
 0x1e0   :  { %1046 = vadd.xlane.f32.xlu1 %v1045_v48  ;;  %v2233_v55 = vpop.f32.mrf.mxu1  ;;  %v966_v48 = vmul.f32 %v2704_v20, %v2964_v63 }
 0x1e1   :  { %1783 = vst.msk [vmem:[%s3773_s7 + $0x130] sm:$0xff] %vm519_vm1, %v3140_v54  ;;  %v3151_v0 = vadd.f32 %v2233_v55, %v2699_v18  ;;  %v1057_v52 = vsel %vm519_vm1, %v967_v47, 0.0  ;;  %v1238_v55 = vmul.f32 %v2964_v63, %v2964_v63 }
 0x1e2   :  { %1043 = vadd.xlane.f32.xlu0 %v1042_v60  ;;  %v918_v3 = vpop.f32.mrf.mxu1  ;;  %v1054_v60 = vsel %vm519_vm1, %v966_v48, 0.0 }
 0x1e3   :  { %1786 = vst.msk [vmem:[%s3773_s7 + $0x148] sm:$0xff] %vm519_vm1, %v3151_v0  ;;  %v3162_v11 = vadd.f32 %v2699_v18, %v918_v3  ;;  %v1326_v3 = vsel %vm519_vm1, %v1238_v55, 0.0 }
 0x1e4   :  { %1315 = vadd.xlane.f32.xlu1 %v1314_v5  ;;  %v2236_v12 = vpop.f32.mrf.mxu1  ;;  %v969_v5 = vmul.f32 %v2704_v20, %v2975_v4 }
 0x1e5   :  { %1785 = vst.msk [vmem:[%s3773_s7 + $0x140] sm:$0xff] %vm519_vm1, %v3162_v11  ;;  %v3173_v22 = vadd.f32 %v2236_v12, %v2699_v18  ;;  %v968_v12 = vmul.f32 %v2704_v20, %v2986_v9 }
 0x1e6   :  { %1324 = vadd.xlane.f32.xlu0 %v1323_v13  ;;  %v928_v24 = vpop.f32.mrf.mxu1  ;;  %v1063_v13 = vsel %vm519_vm1, %v969_v5, 0.0 }
 0x1e7   :  { %1788 = vst.msk [vmem:[%s3773_s7 + $0x158] sm:$0xff] %vm519_vm1, %v3173_v22  ;;  %v3184_v33 = vadd.f32 %v2699_v18, %v928_v24  ;;  %v1329_v18 = vsel %vm519_vm1, %v1239_v39, 0.0  ;;  %v1060_v24 = vsel %vm519_vm1, %v968_v12, 0.0 }
 0x1e8   :  { %1052 = vadd.xlane.f32.xlu1 %v1051_v28  ;;  %v1243_v28 = vmul.f32 %v2997_v15, %v2997_v15 }
 0x1e9   :  { %1787 = vst.msk [vmem:[%s3773_s7 + $0x150] sm:$0xff] %vm519_vm1, %v3184_v33 }
 0x1ea   :  { %1049 = vadd.xlane.f32.xlu0 %v1048_v38  ;;  %v971_v38 = vmul.f32 %v2704_v20, %v2997_v15  ;;  %v1341_v39 = vsel %vm519_vm1, %v1243_v28, 0.0 }
 0x1ec   :  { %1321 = vadd.xlane.f32.xlu1 %v1320_v42  ;;  %v970_v42 = vmul.f32 %v2704_v20, %v3008_v23  ;;  %v1069_v47 = vsel %vm519_vm1, %v971_v38, 0.0 }
 0x1ee   :  { %1330 = vadd.xlane.f32.xlu0 %v1329_v18  ;;  %v1242_v18 = vmul.f32 %v3008_v23, %v3008_v23  ;;  %v1066_v48 = vsel %vm519_vm1, %v970_v42, 0.0 }
 0x1f0   :  { %1058 = vadd.xlane.f32.xlu1 %v1057_v52  ;;  %v1245_v52 = vmul.f32 %v3019_v29, %v3019_v29  ;;  %v1338_v55 = vsel %vm519_vm1, %v1242_v18, 0.0 }
 0x1f2   :  { %1055 = vadd.xlane.f32.xlu0 %v1054_v60  ;;  %v973_v60 = vmul.f32 %v2704_v20, %v3019_v29  ;;  %v1347_v61 = vsel %vm519_vm1, %v1245_v52, 0.0 }
 0x1f4   :  { %1327 = vadd.xlane.f32.xlu1 %v1326_v3  ;;  %v972_v3 = vmul.f32 %v2704_v20, %v3030_v37  ;;  %v1075_v5 = vsel %vm519_vm1, %v973_v60, 0.0 }
 0x1f6   :  { %1336 = vadd.xlane.f32.xlu0 %v1335_v7  ;;  %v1244_v7 = vmul.f32 %v3030_v37, %v3030_v37  ;;  %v1072_v12 = vsel %vm519_vm1, %v972_v3, 0.0 }
 0x1f8   :  { %1064 = vadd.xlane.f32.xlu1 %v1063_v13  ;;  %v1247_v13 = vmul.f32 %v3041_v43, %v3041_v43  ;;  %v1344_v17 = vsel %vm519_vm1, %v1244_v7, 0.0 }
 0x1fa   :  { %1061 = vadd.xlane.f32.xlu0 %v1060_v24  ;;  %v975_v24 = vmul.f32 %v2704_v20, %v3041_v43  ;;  %v1353_v28 = vsel %vm519_vm1, %v1247_v13, 0.0 }
 0x1fc   :  { %1333 = vadd.xlane.f32.xlu1 %v1332_v32  ;;  %v974_v32 = vmul.f32 %v2704_v20, %v3052_v50  ;;  %v1081_v38 = vsel %vm519_vm1, %v975_v24, 0.0  ;;  %v978_v24 = vmul.f32 %v2704_v20, %v3096_v16 }
 0x1fe   :  { %1342 = vadd.xlane.f32.xlu0 %v1341_v39  ;;  %v1246_v39 = vmul.f32 %v3052_v50, %v3052_v50  ;;  %v1078_v42 = vsel %vm519_vm1, %v974_v32, 0.0 }
 0x200   :  { %1070 = vadd.xlane.f32.xlu1 %v1069_v47  ;;  %v1249_v47 = vmul.f32 %v3063_v59, %v3063_v59  ;;  %v1350_v18 = vsel %vm519_vm1, %v1246_v39, 0.0 }
 0x202   :  { %1067 = vadd.xlane.f32.xlu0 %v1066_v48  ;;  %v977_v48 = vmul.f32 %v2704_v20, %v3063_v59  ;;  %v1359_v52 = vsel %vm519_vm1, %v1249_v47, 0.0  ;;  %v1090_v47 = vsel %vm519_vm1, %v978_v24, 0.0 }
 0x204   :  { %1339 = vadd.xlane.f32.xlu1 %v1338_v55  ;;  %v976_v55 = vmul.f32 %v2704_v20, %v3074_v1  ;;  %v1087_v60 = vsel %vm519_vm1, %v977_v48, 0.0 }
 0x206   :  { %1348 = vadd.xlane.f32.xlu0 %v1347_v61  ;;  %v1248_v61 = vmul.f32 %v3074_v1, %v3074_v1  ;;  %v1084_v3 = vsel %vm519_vm1, %v976_v55, 0.0 }
 0x208   :  { %1076 = vadd.xlane.f32.xlu1 %v1075_v5  ;;  %v1251_v5 = vmul.f32 %v3085_v8, %v3085_v8  ;;  %v1356_v7 = vsel %vm519_vm1, %v1248_v61, 0.0 }
 0x20a   :  { %1073 = vadd.xlane.f32.xlu0 %v1072_v12  ;;  %v979_v12 = vmul.f32 %v2704_v20, %v3085_v8  ;;  %v1365_v13 = vsel %vm519_vm1, %v1251_v5, 0.0 }
 0x20c   :  { %1345 = vadd.xlane.f32.xlu1 %v1344_v17  ;;  %v3270_v17 = vld [vmem:[#allocation2] ss:$0 sm:$0xff]  ;;  %v1093_v32 = vsel %vm519_vm1, %v979_v12, 0.0 }
 0x20e   :  { %1354 = vadd.xlane.f32.xlu0 %v1353_v28 }
 0x210   :  { %1082 = vadd.xlane.f32.xlu1 %v1081_v38  ;;  %v1250_v38 = vmul.f32 %v3096_v16, %v3096_v16 }
 0x212   :  { %1079 = vadd.xlane.f32.xlu0 %v1078_v42  ;;  %v1362_v55 = vsel %vm519_vm1, %v1250_v38, 0.0 }
 0x214   :  { %1351 = vadd.xlane.f32.xlu1 %v1350_v18  ;;  %v1253_v18 = vmul.f32 %v3107_v27, %v3107_v27 }
 0x216   :  { %1360 = vadd.xlane.f32.xlu0 %v1359_v52  ;;  %v1371_v5 = vsel %vm519_vm1, %v1253_v18, 0.0 }
 0x218   :  { %1088 = vadd.xlane.f32.xlu1 %v1087_v60  ;;  %v981_v60 = vmul.f32 %v2704_v20, %v3107_v27 }
 0x21a   :  { %1085 = vadd.xlane.f32.xlu0 %v1084_v3  ;;  %v1099_v24 = vsel %vm519_vm1, %v981_v60, 0.0 }
 0x21c   :  { %1357 = vadd.xlane.f32.xlu1 %v1356_v7  ;;  %v980_v7 = vmul.f32 %v2704_v20, %v3118_v34 }
 0x21e   :  { %1366 = vadd.xlane.f32.xlu0 %v1365_v13 }
 0x21f   :  { %v993_v28 = vpop.xlane.xlu0 %992 }
 0x220   :  { %v1128_v39 = vadd.f32 %v3270_v17, %v993_v28  ;;  %1094 = vadd.xlane.f32.xlu1 %v1093_v32  ;;  %v1252_v28 = vmul.f32 %v3118_v34, %v3118_v34 }
 0x221   :  { %v1262_v42 = vpop.xlane.xlu1 %1261 }
 0x222   :  { %1173 = vst.msk [vmem:[%s3775_s9 + $0x8] sm:$0xff] %vm1171_vm2, %v1128_v39  ;;  %v1392_v48 = vadd.f32 1e-24, %v1262_v42  ;;  %1091 = vadd.xlane.f32.xlu0 %v1090_v47  ;;  %v1096_v39 = vsel %vm519_vm1, %v980_v7, 0.0  ;;  %v1255_v42 = vmul.f32 %v3129_v44, %v3129_v44 }
 0x223   :  { %v1265_v52 = vpop.xlane.xlu0 %1264 }
 0x224   :  { %2253 = vrsqrt.f32 %v1392_v48  ;;  %v1393_v61 = vadd.f32 1e-24, %v1265_v52  ;;  %1363 = vadd.xlane.f32.xlu1 %v1362_v55  ;;  %v1368_v48 = vsel %vm519_vm1, %v1252_v28, 0.0  ;;  %v983_v52 = vmul.f32 %v2704_v20, %v3129_v44 }
 0x225   :  { %v999_v3 = vpop.xlane.xlu1 %998 }
 0x226   :  { %2255 = vrsqrt.f32 %v1393_v61  ;;  %v1130_v12 = vadd.f32 %v3270_v17, %v999_v3  ;;  %1372 = vadd.xlane.f32.xlu0 %v1371_v5  ;;  %v1377_v61 = vsel %vm519_vm1, %v1255_v42, 0.0  ;;  %v982_v3 = vmul.f32 %v2704_v20, %v3140_v54 }
 0x227   :  { %v990_v13 = vpop.xlane.xlu0 %989 }
 0x228   :  { %1175 = vst.msk [vmem:[%s3775_s9 + $0x18] sm:$0xff] %vm1171_vm2, %v1130_v12  ;;  %v1127_v32 = vadd.f32 %v3270_v17, %v990_v13  ;;  %1100 = vadd.xlane.f32.xlu1 %v1099_v24  ;;  %v1105_v12 = vsel %vm519_vm1, %v983_v52, 0.0  ;;  %v1254_v13 = vmul.f32 %v3140_v54, %v3140_v54 }
 0x229   :  { %v996_v38 = vpop.xlane.xlu1 %995 }
 0x22a   :  { %1172 = vst.msk [vmem:[%s3775_s9] sm:$0xff] %vm1171_vm2, %v1127_v32  ;;  %v1129_v47 = vadd.f32 %v3270_v17, %v996_v38  ;;  %1097 = vadd.xlane.f32.xlu0 %v1096_v39  ;;  %v1102_v38 = vsel %vm519_vm1, %v982_v3, 0.0  ;;  %v1257_v39 = vmul.f32 %v3151_v0, %v3151_v0  ;;  %v1374_v52 = vsel %vm519_vm1, %v1254_v13, 0.0 }
 0x22b   :  { %v1271_v18 = vpop.xlane.xlu0 %1270 }
 0x22c   :  { %1174 = vst.msk [vmem:[%s3775_s9 + $0x10] sm:$0xff] %vm1171_vm2, %v1129_v47  ;;  %v1395_v55 = vadd.f32 1e-24, %v1271_v18  ;;  %1369 = vadd.xlane.f32.xlu1 %v1368_v48 }
 0x22d   :  { %v1268_v60 = vpop.xlane.xlu1 %1267 }
 0x22e   :  { %2257 = vrsqrt.f32 %v1395_v55  ;;  %v1394_v5 = vadd.f32 1e-24, %v1268_v60  ;;  %1378 = vadd.xlane.f32.xlu0 %v1377_v61  ;;  %v985_v55 = vmul.f32 %v2704_v20, %v3151_v0 }
 0x22f   :  { %v1277_v7 = vpop.xlane.xlu0 %1276 }
 0x230   :  { %2259 = vrsqrt.f32 %v1394_v5  ;;  %v1397_v24 = vadd.f32 1e-24, %v1277_v7  ;;  %1106 = vadd.xlane.f32.xlu1 %v1105_v12  ;;  %v1383_v5 = vsel %vm519_vm1, %v1257_v39, 0.0  ;;  %v984_v7 = vmul.f32 %v2704_v20, %v3162_v11 }
 0x231   :  { %v2254_v28 = vpop.eup %2253  ;;  %v1005_v32 = vpop.xlane.xlu1 %1004 }
 0x232   :  { %v1480_v42 = vmul.f32 %v2254_v28, %v2715_v57  ;;  %2261 = vrsqrt.f32 %v1397_v24  ;;  %v1132_v47 = vadd.f32 %v3270_v17, %v1005_v32  ;;  %1103 = vadd.xlane.f32.xlu0 %v1102_v38  ;;  %v1111_v24 = vsel %vm519_vm1, %v985_v55, 0.0 }
 0x233   :  { %v2256_v18 = vpop.eup %2255  ;;  %v1002_v48 = vpop.xlane.xlu0 %1001  ;;  %v1256_v28 = vmul.f32 %v3162_v11, %v3162_v11  ;;  %v1108_v39 = vsel %vm519_vm1, %v984_v7, 0.0  ;;  %v1258_v55 = vmul.f32 %v3184_v33, %v3184_v33  ;;  %v1259_v7 = vmul.f32 %v3173_v22, %v3173_v22 }
 0x234   :  { %v1937_v60 = vpack.c.bf16 %v1480_v42, %v1480_v42  ;;  %v1481_v61 = vmul.f32 %v2256_v18, %v2707_v21  ;;  %1177 = vst.msk [vmem:[%s3775_s9 + $0x28] sm:$0xff] %vm1171_vm2, %v1132_v47  ;;  %v1131_v57 = vadd.f32 %v3270_v17, %v1002_v48  ;;  %1375 = vadd.xlane.f32.xlu1 %v1374_v52 }
 0x235   :  { %v1274_v3 = vpop.xlane.xlu1 %1273  ;;  %v986_v42 = vmul.f32 %v2704_v20, %v3184_v33  ;;  %v1380_v52 = vsel %vm519_vm1, %v1256_v28, 0.0  ;;  %v1386_v28 = vsel %vm519_vm1, %v1258_v55, 0.0 }
 0x236   :  { %1701 = vst.msk [vmem:[%s3776_s8] sm:$0xf] %vm1700_vm3, %v1937_v60  ;;  %v1938_v21 = vpack.c.bf16 %v1481_v61, %v1481_v61  ;;  %v1396_v12 = vadd.f32 1e-24, %v1274_v3  ;;  %1384 = vadd.xlane.f32.xlu0 %v1383_v5 }
 0x237   :  { %1176 = vst.msk [vmem:[%s3775_s9 + $0x20] sm:$0xff] %vm1171_vm2, %v1131_v57  ;;  %v1283_v13 = vpop.xlane.xlu0 %1282  ;;  %v1114_v5 = vsel %vm519_vm1, %v986_v42, 0.0 }
 0x238   :  { %1702 = vst.msk [vmem:[%s3776_s8 + $0x4] sm:$0xf] %vm1700_vm3, %v1938_v21  ;;  %2263 = vrsqrt.f32 %v1396_v12  ;;  %v1399_v32 = vadd.f32 1e-24, %v1283_v13  ;;  %1112 = vadd.xlane.f32.xlu1 %v1111_v24 }
 0x239   :  { %v1011_v38 = vpop.xlane.xlu1 %1010 }
 0x23a   :  { %2265 = vrsqrt.f32 %v1399_v32  ;;  %v1134_v47 = vadd.f32 %v3270_v17, %v1011_v38  ;;  %1109 = vadd.xlane.f32.xlu0 %v1108_v39  ;;  %v987_v32 = vmul.f32 %v2704_v20, %v3173_v22 }
 0x23b   :  { %v2258_v18 = vpop.eup %2257  ;;  %v1008_v48 = vpop.xlane.xlu0 %1007 }
 0x23c   :  { %v1483_v60 = vmul.f32 %v2258_v18, %v2725_v25  ;;  %1179 = vst.msk [vmem:[%s3775_s9 + $0x38] sm:$0xff] %vm1171_vm2, %v1134_v47  ;;  %v1133_v61 = vadd.f32 %v3270_v17, %v1008_v48  ;;  %1381 = vadd.xlane.f32.xlu1 %v1380_v52  ;;  %v1389_v47 = vsel %vm519_vm1, %v1259_v7, 0.0  ;;  %v1117_v52 = vsel %vm519_vm1, %v987_v32, 0.0 }
 0x23d   :  { %v2260_v57 = vpop.eup %2259  ;;  %v1280_v3 = vpop.xlane.xlu1 %1279 }
 0x23e   :  { %v1940_v21 = vpack.c.bf16 %v1483_v60, %v1483_v60  ;;  %v1482_v12 = vmul.f32 %v2260_v57, %v2738_v30  ;;  %1178 = vst.msk [vmem:[%s3775_s9 + $0x30] sm:$0xff] %vm1171_vm2, %v1133_v61  ;;  %v1398_v25 = vadd.f32 1e-24, %v1280_v3  ;;  %1115 = vadd.xlane.f32.xlu0 %v1114_v5 }
 0x23f   :  { %v2262_v13 = vpop.eup %2261  ;;  %v1289_v24 = vpop.xlane.xlu0 %1288 }
 0x240   :  { %1704 = vst.msk [vmem:[%s3776_s8 + $0xc] sm:$0xf] %vm1700_vm3, %v1940_v21  ;;  %v1939_v30 = vpack.c.bf16 %v1482_v12, %v1482_v12  ;;  %v1485_v38 = vmul.f32 %v2262_v13, %v2753_v36  ;;  %2267 = vrsqrt.f32 %v1398_v25  ;;  %v1401_v39 = vadd.f32 1e-24, %v1289_v24  ;;  %1387 = vadd.xlane.f32.xlu1 %v1386_v28 }
 0x241   :  { %v1017_v42 = vpop.xlane.xlu1 %1016 }
 0x242   :  { %1703 = vst.msk [vmem:[%s3776_s8 + $0x8] sm:$0xf] %vm1700_vm3, %v1939_v30  ;;  %v1942_v20 = vpack.c.bf16 %v1485_v38, %v1485_v38  ;;  %2269 = vrsqrt.f32 %v1401_v39  ;;  %v1136_v18 = vadd.f32 %v3270_v17, %v1017_v42  ;;  %1390 = vadd.xlane.f32.xlu0 %v1389_v47 }
 0x243   :  { %v1014_v48 = vpop.xlane.xlu0 %1013 }
 0x244   :  { %1706 = vst.msk [vmem:[%s3776_s8 + $0x14] sm:$0xf] %vm1700_vm3, %v1942_v20  ;;  %v1135_v36 = vadd.f32 %v3270_v17, %v1014_v48  ;;  %1118 = vadd.xlane.f32.xlu1 %v1117_v52 }
 0x245   :  { %1181 = vst.msk [vmem:[%s3775_s9 + $0x48] sm:$0xff] %vm1171_vm2, %v1136_v18  ;;  %v2264_v55 = vpop.eup %2263  ;;  %v1286_v60 = vpop.xlane.xlu1 %1285 }
 0x246   :  { %v1484_v61 = vmul.f32 %v2264_v55, %v2764_v40  ;;  %1180 = vst.msk [vmem:[%s3775_s9 + $0x40] sm:$0xff] %vm1171_vm2, %v1135_v36  ;;  %v1400_v57 = vadd.f32 1e-24, %v1286_v60 }
 0x247   :  { %v2266_v3 = vpop.eup %2265  ;;  %v1295_v5 = vpop.xlane.xlu0 %1294 }
 0x248   :  { %v1941_v7 = vpack.c.bf16 %v1484_v61, %v1484_v61  ;;  %v1487_v21 = vmul.f32 %v2266_v3, %v2777_v45  ;;  %2271 = vrsqrt.f32 %v1400_v57  ;;  %v1403_v12 = vadd.f32 1e-24, %v1295_v5 }
 0x249   :  { %v1023_v25 = vpop.xlane.xlu1 %1022 }
 0x24a   :  { %1705 = vst.msk [vmem:[%s3776_s8 + $0x10] sm:$0xf] %vm1700_vm3, %v1941_v7  ;;  %v1944_v40 = vpack.c.bf16 %v1487_v21, %v1487_v21  ;;  %2273 = vrsqrt.f32 %v1403_v12  ;;  %v1138_v13 = vadd.f32 %v3270_v17, %v1023_v25 }
 0x24b   :  { %v1020_v24 = vpop.xlane.xlu0 %1019 }
 0x24c   :  { %1708 = vst.msk [vmem:[%s3776_s8 + $0x1c] sm:$0xf] %vm1700_vm3, %v1944_v40  ;;  %v1137_v45 = vadd.f32 %v3270_v17, %v1020_v24 }
 0x24d   :  { %1183 = vst.msk [vmem:[%s3775_s9 + $0x58] sm:$0xff] %vm1171_vm2, %v1138_v13  ;;  %v2268_v28 = vpop.eup %2267  ;;  %v1292_v32 = vpop.xlane.xlu1 %1291 }
 0x24e   :  { %v1486_v30 = vmul.f32 %v2268_v28, %v2788_v49  ;;  %1182 = vst.msk [vmem:[%s3775_s9 + $0x50] sm:$0xff] %vm1171_vm2, %v1137_v45  ;;  %v1402_v38 = vadd.f32 1e-24, %v1292_v32 }
 0x24f   :  { %v2270_v39 = vpop.eup %2269  ;;  %v1301_v42 = vpop.xlane.xlu0 %1300 }
 0x250   :  { %v1943_v47 = vpack.c.bf16 %v1486_v30, %v1486_v30  ;;  %v1489_v20 = vmul.f32 %v2270_v39, %v2799_v53  ;;  %2275 = vrsqrt.f32 %v1402_v38  ;;  %v1405_v18 = vadd.f32 1e-24, %v1301_v42 }
 0x251   :  { %v1029_v48 = vpop.xlane.xlu1 %1028 }
 0x252   :  { %1707 = vst.msk [vmem:[%s3776_s8 + $0x18] sm:$0xf] %vm1700_vm3, %v1943_v47  ;;  %v1946_v49 = vpack.c.bf16 %v1489_v20, %v1489_v20  ;;  %2277 = vrsqrt.f32 %v1405_v18  ;;  %v1140_v52 = vadd.f32 %v3270_v17, %v1029_v48 }
 0x253   :  { %v1026_v36 = vpop.xlane.xlu0 %1025 }
 0x254   :  { %1710 = vst.msk [vmem:[%s3776_s8 + $0x24] sm:$0xf] %vm1700_vm3, %v1946_v49  ;;  %v1139_v53 = vadd.f32 %v3270_v17, %v1026_v36 }
 0x255   :  { %1185 = vst.msk [vmem:[%s3775_s9 + $0x68] sm:$0xff] %vm1171_vm2, %v1140_v52  ;;  %v2272_v55 = vpop.eup %2271  ;;  %v1298_v60 = vpop.xlane.xlu1 %1297 }
 0x256   :  { %v1488_v61 = vmul.f32 %v2272_v55, %v2810_v58  ;;  %1184 = vst.msk [vmem:[%s3775_s9 + $0x60] sm:$0xff] %vm1171_vm2, %v1139_v53  ;;  %v1404_v57 = vadd.f32 1e-24, %v1298_v60 }
 0x257   :  { %v2274_v3 = vpop.eup %2273  ;;  %v1307_v5 = vpop.xlane.xlu0 %1306 }
 0x258   :  { %v1945_v7 = vpack.c.bf16 %v1488_v61, %v1488_v61  ;;  %v1491_v21 = vmul.f32 %v2274_v3, %v2821_v62  ;;  %2279 = vrsqrt.f32 %v1404_v57  ;;  %v1407_v12 = vadd.f32 1e-24, %v1307_v5 }
 0x259   :  { %v1035_v25 = vpop.xlane.xlu1 %1034 }
 0x25a   :  { %1709 = vst.msk [vmem:[%s3776_s8 + $0x20] sm:$0xf] %vm1700_vm3, %v1945_v7  ;;  %v1948_v58 = vpack.c.bf16 %v1491_v21, %v1491_v21  ;;  %2281 = vrsqrt.f32 %v1407_v12  ;;  %v1142_v40 = vadd.f32 %v3270_v17, %v1035_v25 }
 0x25b   :  { %v1032_v13 = vpop.xlane.xlu0 %1031 }
 0x25c   :  { %1712 = vst.msk [vmem:[%s3776_s8 + $0x2c] sm:$0xf] %vm1700_vm3, %v1948_v58  ;;  %v1141_v62 = vadd.f32 %v3270_v17, %v1032_v13 }
 0x25d   :  { %1187 = vst.msk [vmem:[%s3775_s9 + $0x78] sm:$0xff] %vm1171_vm2, %v1142_v40  ;;  %v2276_v24 = vpop.eup %2275  ;;  %v1304_v45 = vpop.xlane.xlu1 %1303 }
 0x25e   :  { %v1490_v28 = vmul.f32 %v2276_v24, %v2832_v2  ;;  %1186 = vst.msk [vmem:[%s3775_s9 + $0x70] sm:$0xff] %vm1171_vm2, %v1141_v62  ;;  %v1406_v32 = vadd.f32 1e-24, %v1304_v45 }
 0x25f   :  { %v2278_v30 = vpop.eup %2277  ;;  %v1313_v38 = vpop.xlane.xlu0 %1312 }
 0x260   :  { %v1947_v39 = vpack.c.bf16 %v1490_v28, %v1490_v28  ;;  %v1493_v42 = vmul.f32 %v2278_v30, %v2843_v6  ;;  %2283 = vrsqrt.f32 %v1406_v32  ;;  %v1409_v47 = vadd.f32 1e-24, %v1313_v38 }
 0x261   :  { %v1041_v20 = vpop.xlane.xlu1 %1040 }
 0x262   :  { %1711 = vst.msk [vmem:[%s3776_s8 + $0x28] sm:$0xf] %vm1700_vm3, %v1947_v39  ;;  %v1950_v2 = vpack.c.bf16 %v1493_v42, %v1493_v42  ;;  %2285 = vrsqrt.f32 %v1409_v47  ;;  %v1144_v18 = vadd.f32 %v3270_v17, %v1041_v20 }
 0x263   :  { %v1038_v48 = vpop.xlane.xlu0 %1037 }
 0x264   :  { %1714 = vst.msk [vmem:[%s3776_s8 + $0x34] sm:$0xf] %vm1700_vm3, %v1950_v2  ;;  %v1143_v6 = vadd.f32 %v3270_v17, %v1038_v48 }
 0x265   :  { %1189 = vst.msk [vmem:[%s3775_s9 + $0x88] sm:$0xff] %vm1171_vm2, %v1144_v18  ;;  %v2280_v49 = vpop.eup %2279  ;;  %v1310_v52 = vpop.xlane.xlu1 %1309 }
 0x266   :  { %v1492_v36 = vmul.f32 %v2280_v49, %v2854_v10  ;;  %1188 = vst.msk [vmem:[%s3775_s9 + $0x80] sm:$0xff] %vm1171_vm2, %v1143_v6  ;;  %v1408_v53 = vadd.f32 1e-24, %v1310_v52 }
 0x267   :  { %v2282_v55 = vpop.eup %2281  ;;  %v1319_v60 = vpop.xlane.xlu0 %1318 }
 0x268   :  { %v1949_v61 = vpack.c.bf16 %v1492_v36, %v1492_v36  ;;  %v1495_v57 = vmul.f32 %v2282_v55, %v2865_v14  ;;  %2287 = vrsqrt.f32 %v1408_v53  ;;  %v1411_v3 = vadd.f32 1e-24, %v1319_v60 }
 0x269   :  { %v1047_v5 = vpop.xlane.xlu1 %1046 }
 0x26a   :  { %1713 = vst.msk [vmem:[%s3776_s8 + $0x30] sm:$0xf] %vm1700_vm3, %v1949_v61  ;;  %v1952_v10 = vpack.c.bf16 %v1495_v57, %v1495_v57  ;;  %2289 = vrsqrt.f32 %v1411_v3  ;;  %v1146_v7 = vadd.f32 %v3270_v17, %v1047_v5 }
 0x26b   :  { %v1044_v21 = vpop.xlane.xlu0 %1043 }
 0x26c   :  { %1716 = vst.msk [vmem:[%s3776_s8 + $0x3c] sm:$0xf] %vm1700_vm3, %v1952_v10  ;;  %v1145_v14 = vadd.f32 %v3270_v17, %v1044_v21 }
 0x26d   :  { %1191 = vst.msk [vmem:[%s3775_s9 + $0x98] sm:$0xff] %vm1171_vm2, %v1146_v7  ;;  %v2284_v12 = vpop.eup %2283  ;;  %v1316_v25 = vpop.xlane.xlu1 %1315 }
 0x26e   :  { %v1494_v58 = vmul.f32 %v2284_v12, %v2876_v19  ;;  %1190 = vst.msk [vmem:[%s3775_s9 + $0x90] sm:$0xff] %vm1171_vm2, %v1145_v14  ;;  %v1410_v40 = vadd.f32 1e-24, %v1316_v25 }
 0x26f   :  { %v2286_v13 = vpop.eup %2285  ;;  %v1325_v62 = vpop.xlane.xlu0 %1324 }
 0x270   :  { %v1951_v24 = vpack.c.bf16 %v1494_v58, %v1494_v58  ;;  %v1497_v45 = vmul.f32 %v2286_v13, %v2887_v26  ;;  %2291 = vrsqrt.f32 %v1410_v40  ;;  %v1413_v28 = vadd.f32 1e-24, %v1325_v62 }
 0x271   :  { %v1053_v32 = vpop.xlane.xlu1 %1052 }
 0x272   :  { %1715 = vst.msk [vmem:[%s3776_s8 + $0x38] sm:$0xf] %vm1700_vm3, %v1951_v24  ;;  %v1954_v19 = vpack.c.bf16 %v1497_v45, %v1497_v45  ;;  %2293 = vrsqrt.f32 %v1413_v28  ;;  %v1148_v30 = vadd.f32 %v3270_v17, %v1053_v32 }
 0x273   :  { %v1050_v38 = vpop.xlane.xlu0 %1049 }
 0x274   :  { %1718 = vst.msk [vmem:[%s3776_s8 + $0x44] sm:$0xf] %vm1700_vm3, %v1954_v19  ;;  %v1147_v26 = vadd.f32 %v3270_v17, %v1050_v38 }
 0x275   :  { %1193 = vst.msk [vmem:[%s3775_s9 + $0xa8] sm:$0xff] %vm1171_vm2, %v1148_v30  ;;  %v2288_v39 = vpop.eup %2287  ;;  %v1322_v42 = vpop.xlane.xlu1 %1321 }
 0x276   :  { %v1496_v47 = vmul.f32 %v2288_v39, %v2898_v31  ;;  %1192 = vst.msk [vmem:[%s3775_s9 + $0xa0] sm:$0xff] %vm1171_vm2, %v1147_v26  ;;  %v1412_v20 = vadd.f32 1e-24, %v1322_v42 }
 0x277   :  { %v2290_v2 = vpop.eup %2289  ;;  %v1331_v18 = vpop.xlane.xlu0 %1330 }
 0x278   :  { %v1953_v48 = vpack.c.bf16 %v1496_v47, %v1496_v47  ;;  %v1499_v6 = vmul.f32 %v2290_v2, %v2909_v35  ;;  %2295 = vrsqrt.f32 %v1412_v20  ;;  %v1415_v49 = vadd.f32 1e-24, %v1331_v18 }
 0x279   :  { %v1059_v52 = vpop.xlane.xlu1 %1058 }
 0x27a   :  { %1717 = vst.msk [vmem:[%s3776_s8 + $0x40] sm:$0xf] %vm1700_vm3, %v1953_v48  ;;  %v1956_v31 = vpack.c.bf16 %v1499_v6, %v1499_v6  ;;  %2297 = vrsqrt.f32 %v1415_v49  ;;  %v1150_v36 = vadd.f32 %v3270_v17, %v1059_v52 }
 0x27b   :  { %v1056_v53 = vpop.xlane.xlu0 %1055 }
 0x27c   :  { %1720 = vst.msk [vmem:[%s3776_s8 + $0x4c] sm:$0xf] %vm1700_vm3, %v1956_v31  ;;  %v1149_v35 = vadd.f32 %v3270_v17, %v1056_v53 }
 0x27d   :  { %1195 = vst.msk [vmem:[%s3775_s9 + $0xb8] sm:$0xff] %vm1171_vm2, %v1150_v36  ;;  %v2292_v55 = vpop.eup %2291  ;;  %v1328_v60 = vpop.xlane.xlu1 %1327 }
 0x27e   :  { %v1498_v61 = vmul.f32 %v2292_v55, %v2920_v41  ;;  %1194 = vst.msk [vmem:[%s3775_s9 + $0xb0] sm:$0xff] %vm1171_vm2, %v1149_v35  ;;  %v1414_v57 = vadd.f32 1e-24, %v1328_v60 }
 0x27f   :  { %v2294_v3 = vpop.eup %2293  ;;  %v1337_v5 = vpop.xlane.xlu0 %1336 }
 0x280   :  { %v1955_v10 = vpack.c.bf16 %v1498_v61, %v1498_v61  ;;  %v1501_v7 = vmul.f32 %v2294_v3, %v2931_v46  ;;  %2299 = vrsqrt.f32 %v1414_v57  ;;  %v1417_v21 = vadd.f32 1e-24, %v1337_v5 }
 0x281   :  { %v1065_v14 = vpop.xlane.xlu1 %1064 }
 0x282   :  { %1719 = vst.msk [vmem:[%s3776_s8 + $0x48] sm:$0xf] %vm1700_vm3, %v1955_v10  ;;  %v1958_v41 = vpack.c.bf16 %v1501_v7, %v1501_v7  ;;  %2301 = vrsqrt.f32 %v1417_v21  ;;  %v1152_v12 = vadd.f32 %v3270_v17, %v1065_v14 }
 0x283   :  { %v1062_v25 = vpop.xlane.xlu0 %1061 }
 0x284   :  { %1722 = vst.msk [vmem:[%s3776_s8 + $0x54] sm:$0xf] %vm1700_vm3, %v1958_v41  ;;  %v1151_v46 = vadd.f32 %v3270_v17, %v1062_v25 }
 0x285   :  { %1197 = vst.msk [vmem:[%s3775_s9 + $0xc8] sm:$0xff] %vm1171_vm2, %v1152_v12  ;;  %v2296_v58 = vpop.eup %2295  ;;  %v1334_v40 = vpop.xlane.xlu1 %1333 }
 0x286   :  { %v1500_v13 = vmul.f32 %v2296_v58, %v2942_v51  ;;  %1196 = vst.msk [vmem:[%s3775_s9 + $0xc0] sm:$0xff] %vm1171_vm2, %v1151_v46  ;;  %v1416_v62 = vadd.f32 1e-24, %v1334_v40 }
 0x287   :  { %v2298_v24 = vpop.eup %2297  ;;  %v1343_v45 = vpop.xlane.xlu0 %1342 }
 0x288   :  { %v1957_v28 = vpack.c.bf16 %v1500_v13, %v1500_v13  ;;  %v1503_v32 = vmul.f32 %v2298_v24, %v2953_v56  ;;  %2303 = vrsqrt.f32 %v1416_v62  ;;  %v1419_v19 = vadd.f32 1e-24, %v1343_v45 }
 0x289   :  { %v1071_v30 = vpop.xlane.xlu1 %1070 }
 0x28a   :  { %1721 = vst.msk [vmem:[%s3776_s8 + $0x50] sm:$0xf] %vm1700_vm3, %v1957_v28  ;;  %v1960_v51 = vpack.c.bf16 %v1503_v32, %v1503_v32  ;;  %2305 = vrsqrt.f32 %v1419_v19  ;;  %v1154_v38 = vadd.f32 %v3270_v17, %v1071_v30 }
 0x28b   :  { %v1068_v26 = vpop.xlane.xlu0 %1067 }
 0x28c   :  { %1724 = vst.msk [vmem:[%s3776_s8 + $0x5c] sm:$0xf] %vm1700_vm3, %v1960_v51  ;;  %v1153_v56 = vadd.f32 %v3270_v17, %v1068_v26 }
 0x28d   :  { %1199 = vst.msk [vmem:[%s3775_s9 + $0xd8] sm:$0xff] %vm1171_vm2, %v1154_v38  ;;  %v2300_v39 = vpop.eup %2299  ;;  %v1340_v42 = vpop.xlane.xlu1 %1339 }
 0x28e   :  { %v1502_v47 = vmul.f32 %v2300_v39, %v2964_v63  ;;  %1198 = vst.msk [vmem:[%s3775_s9 + $0xd0] sm:$0xff] %vm1171_vm2, %v1153_v56  ;;  %v1418_v20 = vadd.f32 1e-24, %v1340_v42 }
 0x28f   :  { %v2302_v2 = vpop.eup %2301  ;;  %v1349_v18 = vpop.xlane.xlu0 %1348 }
 0x290   :  { %v1959_v48 = vpack.c.bf16 %v1502_v47, %v1502_v47  ;;  %v1505_v6 = vmul.f32 %v2302_v2, %v2975_v4  ;;  %2307 = vrsqrt.f32 %v1418_v20  ;;  %v1421_v49 = vadd.f32 1e-24, %v1349_v18 }
 0x291   :  { %v1077_v52 = vpop.xlane.xlu1 %1076 }
 0x292   :  { %1723 = vst.msk [vmem:[%s3776_s8 + $0x58] sm:$0xf] %vm1700_vm3, %v1959_v48  ;;  %v1962_v63 = vpack.c.bf16 %v1505_v6, %v1505_v6  ;;  %2309 = vrsqrt.f32 %v1421_v49  ;;  %v1156_v31 = vadd.f32 %v3270_v17, %v1077_v52 }
 0x293   :  { %v1074_v36 = vpop.xlane.xlu0 %1073 }
 0x294   :  { %1726 = vst.msk [vmem:[%s3776_s8 + $0x64] sm:$0xf] %vm1700_vm3, %v1962_v63  ;;  %v1155_v4 = vadd.f32 %v3270_v17, %v1074_v36 }
 0x295   :  { %1201 = vst.msk [vmem:[%s3775_s9 + $0xe8] sm:$0xff] %vm1171_vm2, %v1156_v31  ;;  %v2304_v53 = vpop.eup %2303  ;;  %v1346_v35 = vpop.xlane.xlu1 %1345 }
 0x296   :  { %v1504_v55 = vmul.f32 %v2304_v53, %v2986_v9  ;;  %1200 = vst.msk [vmem:[%s3775_s9 + $0xe0] sm:$0xff] %vm1171_vm2, %v1155_v4  ;;  %v1420_v60 = vadd.f32 1e-24, %v1346_v35 }
 0x297   :  { %v2306_v61 = vpop.eup %2305  ;;  %v1355_v57 = vpop.xlane.xlu0 %1354 }
 0x298   :  { %v1961_v3 = vpack.c.bf16 %v1504_v55, %v1504_v55  ;;  %v1507_v5 = vmul.f32 %v2306_v61, %v2997_v15  ;;  %2311 = vrsqrt.f32 %v1420_v60  ;;  %v1423_v10 = vadd.f32 1e-24, %v1355_v57 }
 0x299   :  { %v1083_v7 = vpop.xlane.xlu1 %1082 }
 0x29a   :  { %1725 = vst.msk [vmem:[%s3776_s8 + $0x60] sm:$0xf] %vm1700_vm3, %v1961_v3  ;;  %v1964_v9 = vpack.c.bf16 %v1507_v5, %v1507_v5  ;;  %2313 = vrsqrt.f32 %v1423_v10  ;;  %v1158_v21 = vadd.f32 %v3270_v17, %v1083_v7 }
 0x29b   :  { %v1080_v14 = vpop.xlane.xlu0 %1079 }
 0x29c   :  { %1728 = vst.msk [vmem:[%s3776_s8 + $0x6c] sm:$0xf] %vm1700_vm3, %v1964_v9  ;;  %v1157_v15 = vadd.f32 %v3270_v17, %v1080_v14 }
 0x29d   :  { %1203 = vst.msk [vmem:[%s3775_s9 + $0xf8] sm:$0xff] %vm1171_vm2, %v1158_v21  ;;  %v2308_v41 = vpop.eup %2307  ;;  %v1352_v12 = vpop.xlane.xlu1 %1351 }
 0x29e   :  { %v1506_v25 = vmul.f32 %v2308_v41, %v3008_v23  ;;  %1202 = vst.msk [vmem:[%s3775_s9 + $0xf0] sm:$0xff] %vm1171_vm2, %v1157_v15  ;;  %v1422_v46 = vadd.f32 1e-24, %v1352_v12 }
 0x29f   :  { %v2310_v58 = vpop.eup %2309  ;;  %v1361_v40 = vpop.xlane.xlu0 %1360 }
 0x2a0   :  { %v1963_v13 = vpack.c.bf16 %v1506_v25, %v1506_v25  ;;  %v1509_v62 = vmul.f32 %v2310_v58, %v3019_v29  ;;  %2315 = vrsqrt.f32 %v1422_v46  ;;  %v1425_v24 = vadd.f32 1e-24, %v1361_v40 }
 0x2a1   :  { %v1089_v45 = vpop.xlane.xlu1 %1088 }
 0x2a2   :  { %1727 = vst.msk [vmem:[%s3776_s8 + $0x68] sm:$0xf] %vm1700_vm3, %v1963_v13  ;;  %v1966_v23 = vpack.c.bf16 %v1509_v62, %v1509_v62  ;;  %2317 = vrsqrt.f32 %v1425_v24  ;;  %v1160_v28 = vadd.f32 %v3270_v17, %v1089_v45 }
 0x2a3   :  { %v1086_v32 = vpop.xlane.xlu0 %1085 }
 0x2a4   :  { %1730 = vst.msk [vmem:[%s3776_s8 + $0x74] sm:$0xf] %vm1700_vm3, %v1966_v23  ;;  %v1159_v29 = vadd.f32 %v3270_v17, %v1086_v32 }
 0x2a5   :  { %1205 = vst.msk [vmem:[%s3775_s9 + $0x108] sm:$0xff] %vm1171_vm2, %v1160_v28  ;;  %v2312_v19 = vpop.eup %2311  ;;  %v1358_v30 = vpop.xlane.xlu1 %1357 }
 0x2a6   :  { %v1508_v51 = vmul.f32 %v2312_v19, %v3030_v37  ;;  %1204 = vst.msk [vmem:[%s3775_s9 + $0x100] sm:$0xff] %vm1171_vm2, %v1159_v29  ;;  %v1424_v38 = vadd.f32 1e-24, %v1358_v30 }
 0x2a7   :  { %v2314_v26 = vpop.eup %2313  ;;  %v1367_v56 = vpop.xlane.xlu0 %1366 }
 0x2a8   :  { %v1965_v39 = vpack.c.bf16 %v1508_v51, %v1508_v51  ;;  %v1511_v42 = vmul.f32 %v2314_v26, %v3041_v43  ;;  %2319 = vrsqrt.f32 %v1424_v38  ;;  %v1427_v47 = vadd.f32 1e-24, %v1367_v56 }
 0x2a9   :  { %v1095_v20 = vpop.xlane.xlu1 %1094 }
 0x2aa   :  { %1729 = vst.msk [vmem:[%s3776_s8 + $0x70] sm:$0xf] %vm1700_vm3, %v1965_v39  ;;  %v1968_v37 = vpack.c.bf16 %v1511_v42, %v1511_v42  ;;  %2321 = vrsqrt.f32 %v1427_v47  ;;  %v1162_v2 = vadd.f32 %v3270_v17, %v1095_v20 }
 0x2ab   :  { %v1092_v18 = vpop.xlane.xlu0 %1091 }
 0x2ac   :  { %1732 = vst.msk [vmem:[%s3776_s8 + $0x7c] sm:$0xf] %vm1700_vm3, %v1968_v37  ;;  %v1161_v43 = vadd.f32 %v3270_v17, %v1092_v18 }
 0x2ad   :  { %1207 = vst.msk [vmem:[%s3775_s9 + $0x118] sm:$0xff] %vm1171_vm2, %v1162_v2  ;;  %v2316_v48 = vpop.eup %2315  ;;  %v1364_v6 = vpop.xlane.xlu1 %1363 }
 0x2ae   :  { %v1510_v49 = vmul.f32 %v2316_v48, %v3052_v50  ;;  %1206 = vst.msk [vmem:[%s3775_s9 + $0x110] sm:$0xff] %vm1171_vm2, %v1161_v43  ;;  %v1426_v52 = vadd.f32 1e-24, %v1364_v6 }
 0x2af   :  { %v2318_v63 = vpop.eup %2317  ;;  %v1373_v31 = vpop.xlane.xlu0 %1372 }
 0x2b0   :  { %v1967_v36 = vpack.c.bf16 %v1510_v49, %v1510_v49  ;;  %v1513_v4 = vmul.f32 %v2318_v63, %v3063_v59  ;;  %2323 = vrsqrt.f32 %v1426_v52  ;;  %v1429_v53 = vadd.f32 1e-24, %v1373_v31 }
 0x2b1   :  { %v1101_v35 = vpop.xlane.xlu1 %1100 }
 0x2b2   :  { %1731 = vst.msk [vmem:[%s3776_s8 + $0x78] sm:$0xf] %vm1700_vm3, %v1967_v36  ;;  %v1970_v50 = vpack.c.bf16 %v1513_v4, %v1513_v4  ;;  %2325 = vrsqrt.f32 %v1429_v53  ;;  %v1164_v55 = vadd.f32 %v3270_v17, %v1101_v35 }
 0x2b3   :  { %v1098_v60 = vpop.xlane.xlu0 %1097 }
 0x2b4   :  { %1734 = vst.msk [vmem:[%s3776_s8 + $0x84] sm:$0xf] %vm1700_vm3, %v1970_v50  ;;  %v1163_v59 = vadd.f32 %v3270_v17, %v1098_v60 }
 0x2b5   :  { %1209 = vst.msk [vmem:[%s3775_s9 + $0x128] sm:$0xff] %vm1171_vm2, %v1164_v55  ;;  %v2320_v61 = vpop.eup %2319  ;;  %v1370_v57 = vpop.xlane.xlu1 %1369 }
 0x2b6   :  { %v1512_v3 = vmul.f32 %v2320_v61, %v3074_v1  ;;  %1208 = vst.msk [vmem:[%s3775_s9 + $0x120] sm:$0xff] %vm1171_vm2, %v1163_v59  ;;  %v1428_v5 = vadd.f32 1e-24, %v1370_v57 }
 0x2b7   :  { %v2322_v10 = vpop.eup %2321  ;;  %v1379_v7 = vpop.xlane.xlu0 %1378 }
 0x2b8   :  { %v1969_v9 = vpack.c.bf16 %v1512_v3, %v1512_v3  ;;  %v1515_v21 = vmul.f32 %v2322_v10, %v3085_v8  ;;  %2327 = vrsqrt.f32 %v1428_v5  ;;  %v1431_v14 = vadd.f32 1e-24, %v1379_v7 }
 0x2b9   :  { %v1107_v15 = vpop.xlane.xlu1 %1106 }
 0x2ba   :  { %1733 = vst.msk [vmem:[%s3776_s8 + $0x80] sm:$0xf] %vm1700_vm3, %v1969_v9  ;;  %v1972_v1 = vpack.c.bf16 %v1515_v21, %v1515_v21  ;;  %2329 = vrsqrt.f32 %v1431_v14  ;;  %v1166_v41 = vadd.f32 %v3270_v17, %v1107_v15 }
 0x2bb   :  { %v1104_v12 = vpop.xlane.xlu0 %1103 }
 0x2bc   :  { %1736 = vst.msk [vmem:[%s3776_s8 + $0x8c] sm:$0xf] %vm1700_vm3, %v1972_v1  ;;  %v1165_v8 = vadd.f32 %v3270_v17, %v1104_v12 }
 0x2bd   :  { %1211 = vst.msk [vmem:[%s3775_s9 + $0x138] sm:$0xff] %vm1171_vm2, %v1166_v41  ;;  %v2324_v25 = vpop.eup %2323  ;;  %v1376_v46 = vpop.xlane.xlu1 %1375 }
 0x2be   :  { %v1514_v58 = vmul.f32 %v2324_v25, %v3096_v16  ;;  %1210 = vst.msk [vmem:[%s3775_s9 + $0x130] sm:$0xff] %vm1171_vm2, %v1165_v8  ;;  %v1430_v40 = vadd.f32 1e-24, %v1376_v46 }
 0x2bf   :  { %v2326_v13 = vpop.eup %2325  ;;  %v1385_v62 = vpop.xlane.xlu0 %1384 }
 0x2c0   :  { %v1971_v24 = vpack.c.bf16 %v1514_v58, %v1514_v58  ;;  %v1517_v45 = vmul.f32 %v2326_v13, %v3107_v27  ;;  %2331 = vrsqrt.f32 %v1430_v40  ;;  %v1433_v23 = vadd.f32 1e-24, %v1385_v62 }
 0x2c1   :  { %v1113_v28 = vpop.xlane.xlu1 %1112 }
 0x2c2   :  { %1735 = vst.msk [vmem:[%s3776_s8 + $0x88] sm:$0xf] %vm1700_vm3, %v1971_v24  ;;  %v1974_v16 = vpack.c.bf16 %v1517_v45, %v1517_v45  ;;  %2333 = vrsqrt.f32 %v1433_v23  ;;  %v1168_v32 = vadd.f32 %v3270_v17, %v1113_v28 }
 0x2c3   :  { %v1110_v29 = vpop.xlane.xlu0 %1109 }
 0x2c4   :  { %1738 = vst.msk [vmem:[%s3776_s8 + $0x94] sm:$0xf] %vm1700_vm3, %v1974_v16  ;;  %v1167_v27 = vadd.f32 %v3270_v17, %v1110_v29 }
 0x2c5   :  { %1213 = vst.msk [vmem:[%s3775_s9 + $0x148] sm:$0xff] %vm1171_vm2, %v1168_v32  ;;  %v2328_v19 = vpop.eup %2327  ;;  %v1382_v30 = vpop.xlane.xlu1 %1381 }
 0x2c6   :  { %v1516_v51 = vmul.f32 %v2328_v19, %v3118_v34  ;;  %1212 = vst.msk [vmem:[%s3775_s9 + $0x140] sm:$0xff] %vm1171_vm2, %v1167_v27  ;;  %v1432_v38 = vadd.f32 1e-24, %v1382_v30 }
 0x2c7   :  { %v2330_v26 = vpop.eup %2329  ;;  %v1116_v56 = vpop.xlane.xlu0 %1115 }
 0x2c8   :  { %v1973_v39 = vpack.c.bf16 %v1516_v51, %v1516_v51  ;;  %v1519_v42 = vmul.f32 %v2330_v26, %v3129_v44  ;;  %2335 = vrsqrt.f32 %v1432_v38  ;;  %v1169_v47 = vadd.f32 %v3270_v17, %v1116_v56 }
 0x2c9   :  { %v1388_v20 = vpop.xlane.xlu1 %1387 }
 0x2ca   :  { %1737 = vst.msk [vmem:[%s3776_s8 + $0x90] sm:$0xf] %vm1700_vm3, %v1973_v39  ;;  %v1976_v34 = vpack.c.bf16 %v1519_v42, %v1519_v42  ;;  %v1434_v37 = vadd.f32 1e-24, %v1388_v20 }
 0x2cb   :  { %1214 = vst.msk [vmem:[%s3775_s9 + $0x150] sm:$0xff] %vm1171_vm2, %v1169_v47  ;;  %v1391_v2 = vpop.xlane.xlu0 %1390 }
 0x2cc   :  { %1740 = vst.msk [vmem:[%s3776_s8 + $0x9c] sm:$0xf] %vm1700_vm3, %v1976_v34  ;;  %2337 = vrsqrt.f32 %v1434_v37  ;;  %v1435_v44 = vadd.f32 1e-24, %v1391_v2 }
 0x2cd   :  { %v2332_v18 = vpop.eup %2331  ;;  %v1119_v43 = vpop.xlane.xlu1 %1118 }
 0x2ce   :  { %v1518_v48 = vmul.f32 %v2332_v18, %v3140_v54  ;;  %2339 = vrsqrt.f32 %v1435_v44  ;;  %v1170_v6 = vadd.f32 %v3270_v17, %v1119_v43 }
 0x2cf   :  { %v2334_v49 = vpop.eup %2333 }
 0x2d0   :  { %v1975_v52 = vpack.c.bf16 %v1518_v48, %v1518_v48  ;;  %v1521_v63 = vmul.f32 %v2334_v49, %v3151_v0  ;;  %1215 = vst.msk [vmem:[%s3775_s9 + $0x158] sm:$0xff] %vm1171_vm2, %v1170_v6 }
 0x2d2   :  { %1739 = vst.msk [vmem:[%s3776_s8 + $0x98] sm:$0xf] %vm1700_vm3, %v1975_v52  ;;  %v1978_v31 = vpack.c.bf16 %v1521_v63, %v1521_v63 }
 0x2d4   :  { %1742 = vst.msk [vmem:[%s3776_s8 + $0xa4] sm:$0xf] %vm1700_vm3, %v1978_v31 }
 0x2d5   :  { %v2336_v54 = vpop.eup %2335 }
 0x2d6   :  { %v1520_v17 = vmul.f32 %v2336_v54, %v3162_v11 }
 0x2d8   :  { %v1977_v0 = vpack.c.bf16 %v1520_v17, %v1520_v17 }
 0x2d9   :  { %v2338_v36 = vpop.eup %2337 }
 0x2da   :  { %1741 = vst.msk [vmem:[%s3776_s8 + $0xa0] sm:$0xf] %vm1700_vm3, %v1977_v0  ;;  %v1522_v4 = vmul.f32 %v2338_v36, %v3184_v33 }
 0x2db   :  { %v2340_v53 = vpop.eup %2339 }
 0x2dc   :  { %v1979_v35 = vpack.c.bf16 %v1522_v4, %v1522_v4  ;;  %v1523_v50 = vmul.f32 %v2340_v53, %v3173_v22 }
 0x2de   :  { %1743 = vst.msk [vmem:[%s3776_s8 + $0xa8] sm:$0xf] %vm1700_vm3, %v1979_v35  ;;  %v1980_v55 = vpack.c.bf16 %v1523_v50, %v1523_v50 }
 0x2e0   :  { %1744 = vst.msk [vmem:[%s3776_s8 + $0xac] sm:$0xf] %vm1700_vm3, %v1980_v55 }

</bundles_post_ra>
